<compile_context>
chip_gen: v7x
topology: tpu7x:2x2x1
jax: 0.10.0
libtpu: 0.0.40
codegen_flags: <defaults>
</compile_context>

<pallas_src>
import math

import jax
import jax.numpy as jnp
from jax import lax
from jax.experimental import pallas as pl
from jax.experimental.pallas import tpu as pltpu


# ----------------------------------------------------------------------------
# Kernel
# ----------------------------------------------------------------------------
def make_encoder_kernel(num_hidden):
    """num_hidden counts the (H, H) hidden Linear layers (module default 4)."""

    def kernel(x_ref, w_in_ref, w_h_ref, w_out_t_ref, b_ref, b_out_ref, out_ref):
        # x_ref      : (bb, pad_param)          f32   per-step activation tile
        # w_in_ref   : (pad_param, H)           bf16  resident
        # w_h_ref    : (num_hidden, H, H)       bf16  resident (stacked)
        # w_out_t_ref: (latent, H)              bf16  resident (W_out transposed)
        # b_ref      : (num_hidden + 1, 1, H)   f32   resident (stacked)
        # b_out_ref  : (latent, 1)              f32   resident
        # out_ref    : (latent, bb)             f32   per-step output tile

        # Input layer: bf16 operands into the MXU, f32 accumulation.
        h = jnp.dot(x_ref[...].astype(jnp.bfloat16), w_in_ref[...],
                    preferred_element_type=jnp.float32) + b_ref[0]
        h = jnp.maximum(h, 0.0)                      # hidden_activation = F.relu

        # Hidden layers (statically unrolled; static slice of the weight stack).
        for i in range(num_hidden):
            h = jnp.dot(h.astype(jnp.bfloat16), w_h_ref[i],
                        preferred_element_type=jnp.float32) + b_ref[i + 1]
            h = jnp.maximum(h, 0.0)

        # Output layer, computed transposed: (latent, H) x (bb, H)^T -> (latent, bb).
        # Keeps the output store lane-dense at latent_dim lanes << 128.
        s = lax.dot_general(
            w_out_t_ref[...], h.astype(jnp.bfloat16),
            dimension_numbers=(((1,), (1,)), ((), ())),
            preferred_element_type=jnp.float32)
        out_ref[...] = jnp.tanh(s + b_out_ref[...])  # output_activation = F.tanh

    return kernel


# ----------------------------------------------------------------------------
# Wrapper
# ----------------------------------------------------------------------------
def dynamics_encoder_forward(theta, Ws, bs, *, block_batch=None):
    """Fused DynamicsEncoder forward: theta (B, param_dim) -> (B, latent_dim).

    Ws[i] has shape (in_features, out_features); bs[i] has shape (out_features,).
    """
    n_layers = len(Ws)
    num_hidden = n_layers - 2                      # input + num_hidden + output
    assert num_hidden >= 1
    batch, param_dim = theta.shape
    hidden_dim = Ws[0].shape[1]
    latent_dim = Ws[-1].shape[1]

    # ---- batch tile selection -------------------------------------------------
    # Big tiles amortize the ~0.35us/step grid overhead (v5e/v6e, single TC);
    # keep >=2 grid steps whenever batch allows so the "parallel" axis can split
    # across v7x's two TensorCores.  Overridable per generation via block_batch.
    if block_batch is None:
        block_batch = min(512, max(128, pl.next_power_of_2(pl.cdiv(batch, 2))))
    n_tiles = pl.cdiv(batch, block_batch)
    padded_batch = int(n_tiles) * block_batch      # static batch assumed
    if padded_batch != batch:
        theta = jnp.pad(theta, ((0, padded_batch - batch), (0, 0)))

    # ---- pack operands: a few big resident arrays instead of 13 small ones ----
    pad_param = ((param_dim + 7) // 8) * 8         # align the lhs K / input lanes
    if pad_param != param_dim:
        theta = jnp.pad(theta, ((0, 0), (0, pad_param - param_dim)))
    theta = theta.astype(jnp.float32)

    w_in = jnp.pad(Ws[0], ((0, pad_param - param_dim), (0, 0))).astype(jnp.bfloat16)
    w_h = jnp.stack(Ws[1:-1]).astype(jnp.bfloat16)                     # (nh, H, H)
    w_out_t = Ws[-1].T.astype(jnp.bfloat16)                            # (latent, H)
    b_stack = jnp.stack([b.reshape(1, -1) for b in bs[:-1]]).astype(jnp.float32)
    b_out = bs[-1].reshape(latent_dim, 1).astype(jnp.float32)

    grid = (padded_batch // block_batch,)
    resident2 = lambda i: (0, 0)                   # constant block -> fetched once
    resident3 = lambda i: (0, 0, 0)

    in_specs = [
        pl.BlockSpec((block_batch, pad_param), lambda i: (i, 0)),
        pl.BlockSpec(w_in.shape, resident2),
        pl.BlockSpec(w_h.shape, resident3),
        pl.BlockSpec(w_out_t.shape, resident2),
        pl.BlockSpec(b_stack.shape, resident3),
        pl.BlockSpec(b_out.shape, resident2),
    ]
    # Transposed, unpadded output: (latent_dim, block_batch) per step — lane-dense,
    # no zero padding written back.
    out_spec = pl.BlockSpec((latent_dim, block_batch), lambda i: (0, i))

    # TODO(synk): if this encoder is invoked every step with fixed weights,
    # amortize the ~0.6 MiB weight DMA across calls (larger fused batches or a
    # cross-call weight-prefetch pattern); that is a call-site change.
    out_t = pl.pallas_call(
        make_encoder_kernel(num_hidden),
        grid=grid,
        in_specs=in_specs,
        out_specs=out_spec,
        out_shape=jax.ShapeDtypeStruct((latent_dim, padded_batch), jnp.float32),
        compiler_params=pltpu.CompilerParams(
            # Batch axis is embarrassingly parallel; on v7x this lets the two
            # TensorCores split the grid.  (If a trace shows only one TC active,
            # switch this axis to pltpu.CORE_PARALLEL.)
            dimension_semantics=("parallel",)),
    )(theta, w_in, w_h, w_out_t, b_stack, b_out)

    return out_t.T[:batch]                         # (batch, latent_dim)


# ----------------------------------------------------------------------------
# Deterministic parameter init (PyTorch nn.Linear style: U(-1/sqrt(fan_in), ..))
# ----------------------------------------------------------------------------
def init_linear(key, fan_in, fan_out):
    kw, kb = jax.random.split(key)
    bound = 1.0 / math.sqrt(fan_in)
    W = jax.random.uniform(kw, (fan_in, fan_out), jnp.float32, -bound, bound)
    b = jax.random.uniform(kb, (fan_out,), jnp.float32, -bound, bound)
    return W, b


def init_mlp(key, dims):
    Ws, bs = [], []
    keys = jax.random.split(key, len(dims) - 1)
    for k, (di, do) in zip(keys, zip(dims[:-1], dims[1:])):
        W, b = init_linear(k, di, do)
        Ws.append(W)
        bs.append(b)
    return Ws, bs


# ----------------------------------------------------------------------------
# Pure-JAX references
# ----------------------------------------------------------------------------
def reference_forward_f32(x, Ws, bs):
    h = x
    for i, (W, b) in enumerate(zip(Ws, bs)):
        h = h @ W + b
        h = jnp.maximum(h, 0.0) if i < len(Ws) - 1 else jnp.tanh(h)
    return h


def reference_forward_bf16(x, Ws, bs):
    """Mirrors the kernel's mixed precision (bf16 dot inputs, f32 accumulate)."""
    h = x.astype(jnp.float32)
    for i, (W, b) in enumerate(zip(Ws, bs)):
        h = jnp.dot(h.astype(jnp.bfloat16), W.astype(jnp.bfloat16),
                    preferred_element_type=jnp.float32) + b
        h = jnp.maximum(h, 0.0) if i < len(Ws) - 1 else jnp.tanh(h)
    return h


# ----------------------------------------------------------------------------
# Main
# ----------------------------------------------------------------------------
if __name__ == "__main__":
    # DynamicsEncoder hyper-parameters (defaults of the torch module).
    batch = 256                 # -> block_batch 128, 2 grid steps (exercises the grid)
    param_dim = 5
    latent_dim = 4
    hidden_dim = 256
    num_hidden_layers = 4

    key = jax.random.PRNGKey(0)
    k_x, k_p = jax.random.split(key)

    theta = jax.random.normal(k_x, (batch, param_dim), jnp.float32)

    # Encoder: param_dim -> 256 -> 256 x4 -> latent_dim (tanh)
    dims = [param_dim] + [hidden_dim] * (num_hidden_layers + 1) + [latent_dim]
    Ws, bs = init_mlp(k_p, dims)

    # TODO(synk): the torch module also constructs an Adam optimizer; that is
    # training-time state with no role in the forward pass, so it is omitted.

    alpha = dynamics_encoder_forward(theta, Ws, bs)
    alpha = jax.block_until_ready(alpha)

    assert alpha.shape == (batch, latent_dim)

    # Tight check vs a reference that mirrors the kernel's mixed precision.
    ref_mixed = reference_forward_bf16(theta, Ws, bs)
    assert jnp.allclose(alpha, ref_mixed, atol=1e-2, rtol=1e-2), \
        "mismatch vs mixed-precision reference"

    # Looser semantic check vs the exact f32 module math (bf16 weights/inputs
    # introduce ~1e-2-scale error; outputs are tanh-bounded).
    ref_f32 = reference_forward_f32(theta, Ws, bs)
    assert float(jnp.max(jnp.abs(alpha - ref_f32))) < 5e-2, \
        "mismatch vs f32 reference"

    print("KERNEL_OK")
</pallas_src>

<mosaic_0001>
module attributes {stable_mosaic.version = 11 : i64} {
  func.func @kernel(%arg0: i32, %arg1: memref<128x8xf32, #tpu.memory_space<vmem>>, %arg2: memref<8x256xbf16, #tpu.memory_space<vmem>>, %arg3: memref<4x256x256xbf16, #tpu.memory_space<vmem>>, %arg4: memref<4x256xbf16, #tpu.memory_space<vmem>>, %arg5: memref<5x1x256xf32, #tpu.memory_space<vmem>>, %arg6: memref<4x1xf32, #tpu.memory_space<vmem>>, %arg7: memref<4x128xf32, #tpu.memory_space<vmem>>) attributes {dimension_semantics = [#tpu.dimension_semantics<parallel>], iteration_bounds = array<i64: 2>, scalar_prefetch = 0 : i64, scratch_operands = 0 : i64, tpu.core_type = #tpu.core_type<tc>, window_params = [{transform_indices = @transform_0, window_bounds = array<i64: 128, 8>}, {pipeline_mode = #tpu.pipeline_mode<synchronous>, transform_indices = @transform_1, window_bounds = array<i64: 8, 256>}, {pipeline_mode = #tpu.pipeline_mode<synchronous>, transform_indices = @transform_2, window_bounds = array<i64: 4, 256, 256>}, {pipeline_mode = #tpu.pipeline_mode<synchronous>, transform_indices = @transform_3, window_bounds = array<i64: 4, 256>}, {pipeline_mode = #tpu.pipeline_mode<synchronous>, transform_indices = @transform_4, window_bounds = array<i64: 5, 1, 256>}, {pipeline_mode = #tpu.pipeline_mode<synchronous>, transform_indices = @transform_5, window_bounds = array<i64: 4, 1>}, {transform_indices = @transform_6, window_bounds = array<i64: 4, 128>}]} {
    %c0 = arith.constant 0 : index
    %c0_0 = arith.constant 0 : index
    %0 = vector.load %arg1[%c0, %c0_0] : memref<128x8xf32, #tpu.memory_space<vmem>>, vector<128x8xf32>
    %1 = arith.truncf %0 : vector<128x8xf32> to vector<128x8xbf16>
    %c0_1 = arith.constant 0 : index
    %c0_2 = arith.constant 0 : index
    %2 = vector.load %arg2[%c0_1, %c0_2] : memref<8x256xbf16, #tpu.memory_space<vmem>>, vector<8x256xbf16>
    %cst = arith.constant dense<0.000000e+00> : vector<128x256xf32>
    %3 = tpu.matmul %1, %2, %cst {dimension_numbers = #tpu.dot_dimension_numbers<[1], [0], [0], [1], [0, 0, 1, 1], [], []>} : vector<128x8xbf16>, vector<8x256xbf16>, vector<128x256xf32> -> vector<128x256xf32>
    %c0_3 = arith.constant 0 : index
    %c0_4 = arith.constant 0 : index
    %c0_5 = arith.constant 0 : index
    %4 = vector.load %arg5[%c0_3, %c0_4, %c0_5] : memref<5x1x256xf32, #tpu.memory_space<vmem>>, vector<1x1x256xf32>
    %5 = vector.shape_cast %4 : vector<1x1x256xf32> to vector<1x256xf32>
    %6 = vector.broadcast %5 : vector<1x256xf32> to vector<128x256xf32>
    %7 = arith.addf %3, %6 : vector<128x256xf32>
    %cst_6 = arith.constant 0.000000e+00 : f32
    %8 = vector.broadcast %cst_6 : f32 to vector<128x256xf32>
    %9 = arith.maximumf %7, %8 : vector<128x256xf32>
    %10 = arith.truncf %9 : vector<128x256xf32> to vector<128x256xbf16>
    %c0_7 = arith.constant 0 : index
    %c0_8 = arith.constant 0 : index
    %c0_9 = arith.constant 0 : index
    %11 = vector.load %arg3[%c0_7, %c0_8, %c0_9] : memref<4x256x256xbf16, #tpu.memory_space<vmem>>, vector<1x256x256xbf16>
    %12 = vector.shape_cast %11 : vector<1x256x256xbf16> to vector<256x256xbf16>
    %cst_10 = arith.constant dense<0.000000e+00> : vector<128x256xf32>
    %13 = tpu.matmul %10, %12, %cst_10 {dimension_numbers = #tpu.dot_dimension_numbers<[1], [0], [0], [1], [0, 0, 1, 1], [], []>} : vector<128x256xbf16>, vector<256x256xbf16>, vector<128x256xf32> -> vector<128x256xf32>
    %c1 = arith.constant 1 : index
    %c0_11 = arith.constant 0 : index
    %c0_12 = arith.constant 0 : index
    %14 = vector.load %arg5[%c1, %c0_11, %c0_12] : memref<5x1x256xf32, #tpu.memory_space<vmem>>, vector<1x1x256xf32>
    %15 = vector.shape_cast %14 : vector<1x1x256xf32> to vector<1x256xf32>
    %16 = vector.broadcast %15 : vector<1x256xf32> to vector<128x256xf32>
    %17 = arith.addf %13, %16 : vector<128x256xf32>
    %cst_13 = arith.constant 0.000000e+00 : f32
    %18 = vector.broadcast %cst_13 : f32 to vector<128x256xf32>
    %19 = arith.maximumf %17, %18 : vector<128x256xf32>
    %20 = arith.truncf %19 : vector<128x256xf32> to vector<128x256xbf16>
    %c1_14 = arith.constant 1 : index
    %c0_15 = arith.constant 0 : index
    %c0_16 = arith.constant 0 : index
    %21 = vector.load %arg3[%c1_14, %c0_15, %c0_16] : memref<4x256x256xbf16, #tpu.memory_space<vmem>>, vector<1x256x256xbf16>
    %22 = vector.shape_cast %21 : vector<1x256x256xbf16> to vector<256x256xbf16>
    %cst_17 = arith.constant dense<0.000000e+00> : vector<128x256xf32>
    %23 = tpu.matmul %20, %22, %cst_17 {dimension_numbers = #tpu.dot_dimension_numbers<[1], [0], [0], [1], [0, 0, 1, 1], [], []>} : vector<128x256xbf16>, vector<256x256xbf16>, vector<128x256xf32> -> vector<128x256xf32>
    %c2 = arith.constant 2 : index
    %c0_18 = arith.constant 0 : index
    %c0_19 = arith.constant 0 : index
    %24 = vector.load %arg5[%c2, %c0_18, %c0_19] : memref<5x1x256xf32, #tpu.memory_space<vmem>>, vector<1x1x256xf32>
    %25 = vector.shape_cast %24 : vector<1x1x256xf32> to vector<1x256xf32>
    %26 = vector.broadcast %25 : vector<1x256xf32> to vector<128x256xf32>
    %27 = arith.addf %23, %26 : vector<128x256xf32>
    %cst_20 = arith.constant 0.000000e+00 : f32
    %28 = vector.broadcast %cst_20 : f32 to vector<128x256xf32>
    %29 = arith.maximumf %27, %28 : vector<128x256xf32>
    %30 = arith.truncf %29 : vector<128x256xf32> to vector<128x256xbf16>
    %c2_21 = arith.constant 2 : index
    %c0_22 = arith.constant 0 : index
    %c0_23 = arith.constant 0 : index
    %31 = vector.load %arg3[%c2_21, %c0_22, %c0_23] : memref<4x256x256xbf16, #tpu.memory_space<vmem>>, vector<1x256x256xbf16>
    %32 = vector.shape_cast %31 : vector<1x256x256xbf16> to vector<256x256xbf16>
    %cst_24 = arith.constant dense<0.000000e+00> : vector<128x256xf32>
    %33 = tpu.matmul %30, %32, %cst_24 {dimension_numbers = #tpu.dot_dimension_numbers<[1], [0], [0], [1], [0, 0, 1, 1], [], []>} : vector<128x256xbf16>, vector<256x256xbf16>, vector<128x256xf32> -> vector<128x256xf32>
    %c3 = arith.constant 3 : index
    %c0_25 = arith.constant 0 : index
    %c0_26 = arith.constant 0 : index
    %34 = vector.load %arg5[%c3, %c0_25, %c0_26] : memref<5x1x256xf32, #tpu.memory_space<vmem>>, vector<1x1x256xf32>
    %35 = vector.shape_cast %34 : vector<1x1x256xf32> to vector<1x256xf32>
    %36 = vector.broadcast %35 : vector<1x256xf32> to vector<128x256xf32>
    %37 = arith.addf %33, %36 : vector<128x256xf32>
    %cst_27 = arith.constant 0.000000e+00 : f32
    %38 = vector.broadcast %cst_27 : f32 to vector<128x256xf32>
    %39 = arith.maximumf %37, %38 : vector<128x256xf32>
    %40 = arith.truncf %39 : vector<128x256xf32> to vector<128x256xbf16>
    %c3_28 = arith.constant 3 : index
    %c0_29 = arith.constant 0 : index
    %c0_30 = arith.constant 0 : index
    %41 = vector.load %arg3[%c3_28, %c0_29, %c0_30] : memref<4x256x256xbf16, #tpu.memory_space<vmem>>, vector<1x256x256xbf16>
    %42 = vector.shape_cast %41 : vector<1x256x256xbf16> to vector<256x256xbf16>
    %cst_31 = arith.constant dense<0.000000e+00> : vector<128x256xf32>
    %43 = tpu.matmul %40, %42, %cst_31 {dimension_numbers = #tpu.dot_dimension_numbers<[1], [0], [0], [1], [0, 0, 1, 1], [], []>} : vector<128x256xbf16>, vector<256x256xbf16>, vector<128x256xf32> -> vector<128x256xf32>
    %c4 = arith.constant 4 : index
    %c0_32 = arith.constant 0 : index
    %c0_33 = arith.constant 0 : index
    %44 = vector.load %arg5[%c4, %c0_32, %c0_33] : memref<5x1x256xf32, #tpu.memory_space<vmem>>, vector<1x1x256xf32>
    %45 = vector.shape_cast %44 : vector<1x1x256xf32> to vector<1x256xf32>
    %46 = vector.broadcast %45 : vector<1x256xf32> to vector<128x256xf32>
    %47 = arith.addf %43, %46 : vector<128x256xf32>
    %cst_34 = arith.constant 0.000000e+00 : f32
    %48 = vector.broadcast %cst_34 : f32 to vector<128x256xf32>
    %49 = arith.maximumf %47, %48 : vector<128x256xf32>
    %c0_35 = arith.constant 0 : index
    %c0_36 = arith.constant 0 : index
    %50 = vector.load %arg4[%c0_35, %c0_36] : memref<4x256xbf16, #tpu.memory_space<vmem>>, vector<4x256xbf16>
    %51 = arith.truncf %49 : vector<128x256xf32> to vector<128x256xbf16>
    %cst_37 = arith.constant dense<0.000000e+00> : vector<4x128xf32>
    %52 = tpu.matmul %50, %51, %cst_37 {dimension_numbers = #tpu.dot_dimension_numbers<[1], [1], [0], [0], [0, 0, 1, 0], [], []>} : vector<4x256xbf16>, vector<128x256xbf16>, vector<4x128xf32> -> vector<4x128xf32>
    %c0_38 = arith.constant 0 : index
    %c0_39 = arith.constant 0 : index
    %53 = vector.load %arg6[%c0_38, %c0_39] : memref<4x1xf32, #tpu.memory_space<vmem>>, vector<4x1xf32>
    %54 = vector.broadcast %53 : vector<4x1xf32> to vector<4x128xf32>
    %55 = arith.addf %52, %54 : vector<4x128xf32>
    %56 = math.tanh %55 : vector<4x128xf32>
    %c0_40 = arith.constant 0 : index
    %c0_41 = arith.constant 0 : index
    %57 = vector.load %arg7[%c0_40, %c0_41] : memref<4x128xf32, #tpu.memory_space<vmem>>, vector<4x128xf32>
    tpu.vector_store %arg7[%c0_40, %c0_41], %56 {strides = array<i32>} : memref<4x128xf32, #tpu.memory_space<vmem>>, vector<4x128xf32>,
    return
  }
  func.func @transform_0(%arg0: i32) -> (i32, i32) {
    %c0_i32 = arith.constant 0 : i32
    %c0_i32_0 = arith.constant 0 : i32
    return %arg0, %c0_i32 : i32, i32
  }
  func.func @transform_1(%arg0: i32) -> (i32, i32) {
    %c0_i32 = arith.constant 0 : i32
    %c0_i32_0 = arith.constant 0 : i32
    %c0_i32_1 = arith.constant 0 : i32
    return %c0_i32, %c0_i32_0 : i32, i32
  }
  func.func @transform_2(%arg0: i32) -> (i32, i32, i32) {
    %c0_i32 = arith.constant 0 : i32
    %c0_i32_0 = arith.constant 0 : i32
    %c0_i32_1 = arith.constant 0 : i32
    %c0_i32_2 = arith.constant 0 : i32
    return %c0_i32, %c0_i32_0, %c0_i32_1 : i32, i32, i32
  }
  func.func @transform_3(%arg0: i32) -> (i32, i32) {
    %c0_i32 = arith.constant 0 : i32
    %c0_i32_0 = arith.constant 0 : i32
    %c0_i32_1 = arith.constant 0 : i32
    return %c0_i32, %c0_i32_0 : i32, i32
  }
  func.func @transform_4(%arg0: i32) -> (i32, i32, i32) {
    %c0_i32 = arith.constant 0 : i32
    %c0_i32_0 = arith.constant 0 : i32
    %c0_i32_1 = arith.constant 0 : i32
    %c0_i32_2 = arith.constant 0 : i32
    return %c0_i32, %c0_i32_0, %c0_i32_1 : i32, i32, i32
  }
  func.func @transform_5(%arg0: i32) -> (i32, i32) {
    %c0_i32 = arith.constant 0 : i32
    %c0_i32_0 = arith.constant 0 : i32
    %c0_i32_1 = arith.constant 0 : i32
    return %c0_i32, %c0_i32_0 : i32, i32
  }
  func.func @transform_6(%arg0: i32) -> (i32, i32) {
    %c0_i32 = arith.constant 0 : i32
    %c0_i32_0 = arith.constant 0 : i32
    return %c0_i32, %arg0 : i32, i32
  }
}

</mosaic_0001>

<bundles_post_ra>
// kernel: tpu_custom_call.1
= control target key start
LH: loop header
LB: loop body
LE: loop exit
PB: predicated region body
PF: predicated region fallthrough
CT: control target
= control target key end

     0   :  { %11 = vsyncpa [#allocation3], 0  ;;  %s3050_s0 = inlined_call_operand.vmem [shape: f32[256,8], index: 0, kind: input, shape index: {}]   ;;  %s3051_s1 = inlined_call_operand.vmem [shape: bf16[8,256], index: 1, kind: input, shape index: {}]   ;;  %s3052_s2 = inlined_call_operand.hbm [shape: bf16[4,256,256], index: 2, kind: input, shape index: {}]   ;;  %s3053_s3 = inlined_call_operand.vmem [shape: bf16[4,256], index: 3, kind: input, shape index: {}]   ;;  %s3054_s4 = inlined_call_operand.vmem [shape: f32[5,1,256], index: 4, kind: input, shape index: {}]   ;;  %s3055_s5 = inlined_call_operand.vmem [shape: f32[4,1], index: 5, kind: input, shape index: {}]   ;;  %s3056_s6 = inlined_call_operand.hbm [shape: f32[4,256], index: 6, kind: output, shape index: {}]  }
   0x1   :  { %12 = vsyncpa [#allocation4], 0 }
   0x2   :  { %14 = vsyncpa [#allocation4 + $0x1], 0  ;;  %s2658_s21 = smov 0   ;;  %s2660_s22 = smov 0  }
   0x3   :  { %s2662_s23 = smov 0   ;;  %s2664_s24 = smov 0  }
   0x4 LB: > { %s2679_s25 = sadd.s32 4294967295, %s2616_s24   ;;  %s2115_s26 = sadd.s32 4294967294, %s2616_s24   ;;  %s2616_s24 = sphi %s2664_s24, %s3072_s24   ;;  %s2612_s23 = sphi %s2662_s23, %s3071_s23   ;;  %s2608_s22 = sphi %s2660_s22, %s3070_s22   ;;  %s2604_s21 = sphi %s2658_s21, %s3069_s21  }
   0x5   : > { %s2683_s27 = sadd.s32 1, %s2616_s24   ;;  %s158_s28 = sadd.s32 1, %s2612_s23 }
   0x6   : > { %s155_s29 = ssub.s32 %s2616_s24, %s2683_s27  ;;  %p168_p0 = scmp.ne.s32.totalorder %s2612_s23, %s2608_s22 }
   0x7   : > { %p156_p1 = scmp.eq.s32.totalorder %s155_s29, 0  ;;  %p169_p2 = scmp.eq.s32.totalorder %s2679_s25, 1 }
   0x8   : > { %p174_p3 = scmp.ne.s32.totalorder %s2608_s22, %s2604_s21  ;;  %p175_p4 = scmp.eq.s32.totalorder %s2115_s26, 1 }
   0x9   : > { %s2694_s30 = scalar_select %p156_p1, %s2612_s23, %s158_s28  }
   0xa   : > { %p2696_p5 = por %p169_p2, %p168_p0  ;;  %p2700_p6 = por %p175_p4, %p174_p3 }
   0xb   : > { %p2116_p7 = scmp.ge.s32.totalorder %s2616_s24, 1  ;;  %p182_p8 = scmp.lt.s32.totalorder %s2616_s24, 3 }
   0xc   : > { %s3060_s7 = scalar_select %p2696_p5, 1, 0 }
   0xd   : > { %s3061_s8 = scalar_select %p2700_p6, 1, 0 }
   0xe   : > { %p3057_p9 = scmp.eq.s32.totalorder %s2679_s25, 0  ;;  %p2707_p10 = pnand %p2116_p7, %p182_p8 }
   0xf   : > { %s2618_s10 = smov [#allocation2]   ;;  %s2522_s15 = scalar_lea.hbm %s3052_s2, 16384 }
  0x10   : > { %s3062_s9 = scalar_select %p2707_p10, 1, 0 }
  0x11   : > { %s197_s11 = sshll.u32 %s2618_s10, 4  ;;  %p2278_p11 = pneg %p2707_p10  ;;  %s198_s11 = int_to_ptr.vmem [resolvable:$true] %s197_s11 }
  0x12   : > { %p2523_p13 = scmp.ne.s32.totalorder %s3052_s2, %s2522_s15  ;;  %p2529_p3 = scmp.lt.u32.totalorder %s2522_s15, %s3052_s2 }
  0x13   : > { %p2715_p12 = pnand %p3057_p9, %p2278_p11 }
  0x15   : > { %p2524_p0 = pneg %p2715_p12 }
  0x17   : > { %p2525_p1 = pnand %p2524_p0, %p2523_p13 }
  0x19   : > { %p2526_p2 = pneg %p2525_p1 }
  0x1b   : > { %p2531_p4 = pnand %p2529_p3, %p2526_p2 }
  0x1d   : > { %2534 = shalt.err (!%p2531_p4)
}
  0x1e   : > { %s2535_s20 = scalar_lea.vmem %s198_s11, 16384  ;;  %p2543_p9 = scmp.lt.s32.totalorder %s198_s11, %s198_s11 }
  0x1f   : > { %p2536_p7 = scmp.ne.s32.totalorder %s198_s11, %s2535_s20  ;;  %p2544_p6 = scmp.lt.s32.totalorder %s2535_s20, %s2535_s20 }
  0x21   : > { %p2538_p8 = pnand %p2536_p7, %p2524_p0  ;;  %p2545_p5 = por %p2544_p6, %p2543_p9 }
  0x23   : > { %p2539_p11 = pneg %p2538_p8 }
  0x25   : > { %p2546_p10 = pnand %p2545_p5, %p2539_p11 }
  0x27   : > { %2549 = shalt.err (!%p2546_p10)
}
  0x28   : > { %s2619_s26 = smov 128   ;;  %s2620_s28 = smov 8  }
  0x29   : > { %2281 = dma.hbm_to_vmem [thread:$0]  (!%p2715_p12), %s3052_s2, 16384, %s198_s11, [#allocation3], %s2619_s26, %s2619_s26, %s2620_s28  }
  0x2a   : > { %p3064_p13 = scmp.ne.s32.totalorder %s3062_s9, 0 }
  0x2b   : > { %p3065_p1 = scmp.eq.s32.totalorder (!%p3064_p13), %s2679_s25, 0 }
  0x2c   : > { %231 = sbr.rel (%p3064_p13) target bundleno = 1473 (0x5c1), region = 44 }
  0x33   : > { %2595 = dma.done.wait (%p3065_p1), [#allocation3], 16384   ;;  %p3066_p0 = pmov %p3065_p1 }
  0x34   : > { %s2122_s13 = sshll.u32 %s2679_s25, 4  ;;  %v2621_v0 = vmov 0   ;;  %v292_v1 = vld [vmem:[%s3051_s1] sm:$0xff]  ;;  %vm335_vm0 = vcmask 1043456   ;;  %vm310_vm1 = vcmask 64512   ;;  %s258_s16 = sand.u32 1, %s2608_s22  }
  0x35   : > { %2597 = vsyncadd (%p3066_p0), [#allocation3], 4294950912  ;;  %374 = vmatprep.mubr.bf16.mxu0 %v2621_v0  ;;  %p262_p5 = scmp.lt.s32.totalorder %s2122_s13, 31  ;;  %2325 = vset.pattern.permute.xlu0 %v2621_v0  ;;  %v2125_v4 = vcombine.high %v292_v1, %v292_v1  ;;  %v2124_v5 = vcombine.low %v292_v1, %v292_v1  ;;  %v2328_v9 = vld [vmem:[#allocation2 + $0x4] ss:$8 sps:$4 sm:$0xff]   ;;  %s2121_s17 = sshll.u32 %s258_s16, 2 }
  0x36   : > { %v2330_v10 = vld [vmem:[#allocation2] ss:$8 sps:$4 sm:$0xff]   ;;  %v2331_v11 = vld [vmem:[#allocation2 + $0x14] ss:$8 sps:$4 sm:$0xff]   ;;  %708 = vmatprep.subr.bf16.mxu1 %v2328_v9  ;;  %v2333_v13 = vld [vmem:[#allocation2 + $0x10] ss:$8 sps:$4 sm:$0xff]  }
  0x37   : > { %s3074_s13 = smov (!%p262_p5, %s2122_s13), 31  ;;  %2126 = vmatprep.subr.msk.bf16.mxu0 %vm335_vm0, %v2125_v4  ;;  %v337_v6 = vsel %vm335_vm0, %v2124_v5, 0  ;;  %709 = vmatpush1.bf16.msra.mxu1 %v2330_v10  ;;  %v2334_v14 = vld [vmem:[#allocation2 + $0x24] ss:$8 sps:$4 sm:$0xff]   ;;  %v2336_v16 = vld [vmem:[#allocation2 + $0x20] ss:$8 sps:$4 sm:$0xff]  }
  0x38   : > { %s2123_s12 = sshll.u32 %s3074_s13, 3  ;;  %343 = vmatpush1.bf16.msra.mxu0 %v337_v6  ;;  %710 = vmatprep.subr.bf16.mxu1 %v2331_v11  ;;  %v2337_v17 = vld [vmem:[#allocation2 + $0x34] ss:$8 sps:$4 sm:$0xff]   ;;  %v2339_v20 = vld [vmem:[#allocation2 + $0x30] ss:$8 sps:$4 sm:$0xff]   ;;  %s2269_s18 = sshll.u32 %s2679_s25, 6 }
  0x39   : > { %s2747_s9 = scalar_lea.vmem %s3050_s0, %s2123_s12  ;;  %v2340_v21 = vld [vmem:[#allocation2 + $0x44] ss:$8 sps:$4 sm:$0xff]   ;;  %v2342_v23 = vld [vmem:[#allocation2 + $0x40] ss:$8 sps:$4 sm:$0xff]   ;;  %v2343_v26 = vld [vmem:[#allocation2 + $0x54] ss:$8 sps:$4 sm:$0xff]   ;;  %s3008_s29 = scalar_lea.hbm %s3056_s6, %s2269_s18 }
  0x3a   : > { %v268_v2 = vld [vmem:[%s2747_s9] sm:$0xff]  ;;  %v269_v3 = vld [vmem:[%s2747_s9 + $0x8] sm:$0xff]  ;;  %v270_v8 = vld [vmem:[%s2747_s9 + $0x10] sm:$0xff]  ;;  %s260_s19 = scalar_lea.vmem [#allocation5], %s2121_s17  ;;  %s2031_s10 = scalar_lea.sflag [#allocation4], %s258_s16 }
  0x3b   : > { %v284_v7 = vpack.c.bf16 %v269_v3, %v268_v2  ;;  %v271_v12 = vld [vmem:[%s2747_s9 + $0x18] sm:$0xff]  ;;  %711 = vmatpush1.bf16.msra.mxu1 %v2333_v13  ;;  %v272_v18 = vld [vmem:[%s2747_s9 + $0x20] sm:$0xff]  ;;  %v273_v19 = vld [vmem:[%s2747_s9 + $0x28] sm:$0xff]  ;;  %s2044_s20 = sshll.u32 %s260_s19, 4  ;;  %p3067_p9 = scmp.ne.s32.totalorder %s3060_s7, 0  ;;  %s3010_s20 = int_to_ptr.vmem [resolvable:$true] %s2044_s20 }
  0x3c   : > { %v285_v15 = vpack.c.bf16 %v271_v12, %v270_v8  ;;  %712 = vmatprep.subr.bf16.mxu1 %v2334_v14  ;;  %v286_v22 = vpack.c.bf16 %v273_v19, %v272_v18  ;;  %v274_v24 = vld [vmem:[%s2747_s9 + $0x30] sm:$0xff]  ;;  %v275_v25 = vld [vmem:[%s2747_s9 + $0x38] sm:$0xff]  ;;  %v2346_v28 = vld [vmem:[#allocation2 + $0x64] ss:$8 sps:$4 sm:$0xff]   ;;  %s2550_s13 = scalar_lea.vmem %s3010_s20, 64  ;;  %s2622_s25 = smov [#allocation5]  }
  0x3d   : > { %2127 = vmatmul.mubr.msk.bf16.vlgmr.msra.gmra.mrb[0].mxu0 %vm310_vm1, %v284_v7  ;;  %v2345_v27 = vld [vmem:[#allocation2 + $0x50] ss:$8 sps:$4 sm:$0xff]   ;;  %v287_v29 = vpack.c.bf16 %v275_v25, %v274_v24  ;;  %v2348_v30 = vld [vmem:[#allocation2 + $0x60] ss:$8 sps:$4 sm:$0xff]   ;;  %v2349_v31 = vld [vmem:[#allocation2 + $0x74] ss:$8 sps:$4 sm:$0xff]   ;;  %p2551_p6 = scmp.ne.s32.totalorder %s3010_s20, %s2550_s13 }
  0x3e   : > { %384 = vmatprep.mubr.bf16.mxu0 %v2621_v0  ;;  %v276_v32 = vld [vmem:[%s2747_s9 + $0x40] sm:$0xff]  ;;  %v277_v33 = vld [vmem:[%s2747_s9 + $0x48] sm:$0xff]  ;;  %v2351_v34 = vld [vmem:[#allocation2 + $0x70] ss:$8 sps:$4 sm:$0xff]   ;;  %s2554_s12 = sshll.u32 %s2622_s25, 4  ;;  %s2555_s12 = int_to_ptr.vmem [resolvable:$false] %s2554_s12 }
  0x3f   : > { %713 = vmatpush1.bf16.msra.mxu1 %v2336_v16  ;;  %v2352_v35 = vld [vmem:[#allocation2 + $0x84] ss:$8 sps:$4 sm:$0xff]   ;;  %v288_v36 = vpack.c.bf16 %v277_v33, %v276_v32  ;;  %v2354_v37 = vld [vmem:[#allocation2 + $0x80] ss:$8 sps:$4 sm:$0xff]   ;;  %v2355_v38 = vld [vmem:[#allocation2 + $0x94] ss:$8 sps:$4 sm:$0xff]   ;;  %p2552_p10 = pnand %p2551_p6, %p3067_p9  ;;  %p2557_p2 = scmp.lt.s32.totalorder %s3010_s20, %s2555_s12 }
  0x40   : > { %714 = vmatprep.subr.bf16.mxu1 %v2337_v17  ;;  %v278_v39 = vld [vmem:[%s2747_s9 + $0x50] sm:$0xff]  ;;  %v279_v40 = vld [vmem:[%s2747_s9 + $0x58] sm:$0xff]  ;;  %v2358_v42 = vld [vmem:[#allocation2 + $0xa4] ss:$8 sps:$4 sm:$0xff]   ;;  %s2556_s11 = scalar_lea.vmem %s2555_s12, 128 }
  0x41   : > { %v2357_v41 = vld [vmem:[#allocation2 + $0x90] ss:$8 sps:$4 sm:$0xff]   ;;  %v289_v43 = vpack.c.bf16 %v279_v40, %v278_v39  ;;  %v2360_v44 = vld [vmem:[#allocation2 + $0xa0] ss:$8 sps:$4 sm:$0xff]   ;;  %v2361_v45 = vld [vmem:[#allocation2 + $0xb4] ss:$8 sps:$4 sm:$0xff]   ;;  %p2553_p12 = pneg %p2552_p10  ;;  %p2558_p3 = scmp.lt.s32.totalorder %s2556_s11, %s2550_s13 }
  0x42   : > { %v280_v46 = vld [vmem:[%s2747_s9 + $0x60] sm:$0xff]  ;;  %v281_v47 = vld [vmem:[%s2747_s9 + $0x68] sm:$0xff]  ;;  %v2363_v48 = vld [vmem:[#allocation2 + $0xb0] ss:$8 sps:$4 sm:$0xff]  }
  0x43   : > { %715 = vmatpush1.bf16.msra.mxu1 %v2339_v20  ;;  %v2364_v49 = vld [vmem:[#allocation2 + $0xc4] ss:$8 sps:$4 sm:$0xff]   ;;  %v290_v50 = vpack.c.bf16 %v281_v47, %v280_v46  ;;  %v2366_v51 = vld [vmem:[#allocation2 + $0xc0] ss:$8 sps:$4 sm:$0xff]   ;;  %v2367_v52 = vld [vmem:[#allocation2 + $0xd4] ss:$8 sps:$4 sm:$0xff]   ;;  %p2559_p4 = por %p2558_p3, %p2557_p2 }
  0x44   : > { %716 = vmatprep.subr.bf16.mxu1 %v2340_v21  ;;  %v282_v53 = vld [vmem:[%s2747_s9 + $0x70] sm:$0xff]  ;;  %v283_v54 = vld [vmem:[%s2747_s9 + $0x78] sm:$0xff]  ;;  %v2370_v57 = vld [vmem:[#allocation2 + $0xe4] ss:$8 sps:$4 sm:$0xff]  }
  0x45   : > { %2128 = vmatmul.mubr.msk.bf16.gmra.mrb[4].mxu0 %vm310_vm1, %v285_v15  ;;  %v291_v55 = vpack.c.bf16 %v283_v54, %v282_v53  ;;  %v2369_v56 = vld [vmem:[#allocation2 + $0xd0] ss:$8 sps:$4 sm:$0xff]   ;;  %v2372_v58 = vld [vmem:[#allocation2 + $0xe0] ss:$8 sps:$4 sm:$0xff]   ;;  %v2373_v59 = vld [vmem:[#allocation2 + $0xf4] ss:$8 sps:$4 sm:$0xff]   ;;  %p2560_p7 = pnand %p2559_p4, %p2553_p12 }
  0x46   : > { %394 = vmatprep.mubr.bf16.mxu0 %v2621_v0  ;;  %v2375_v60 = vld [vmem:[#allocation2 + $0xf0] ss:$8 sps:$4 sm:$0xff]   ;;  %v2376_v61 = vld [vmem:[#allocation2 + $0x100] ss:$8 sps:$4 sm:$0xff]   ;;  %v2378_v62 = vld [vmem:[#allocation2 + $0x104] ss:$8 sps:$4 sm:$0xff]  }
  0x47   : > { %717 = vmatpush1.bf16.msra.mxu1 %v2342_v23  ;;  %v2381_v63 = vld [vmem:[#allocation2 + $0x114] ss:$8 sps:$4 sm:$0xff]   ;;  %1075 = vmatprep.subr.bf16.mxu0 %v2378_v62  ;;  %v2384_v1 = vld [vmem:[#allocation2 + $0x124] ss:$8 sps:$4 sm:$0xff]   ;;  %v2382_v2 = vld [vmem:[#allocation2 + $0x120] ss:$8 sps:$4 sm:$0xff]  }
  0x48   : > { %718 = vmatprep.subr.bf16.mxu1 %v2343_v26  ;;  %1076 = vmatpush1.bf16.msra.mxu0 %v2376_v61  ;;  %v2387_v3 = vld [vmem:[#allocation2 + $0x134] ss:$8 sps:$4 sm:$0xff]   ;;  %v2385_v4 = vld [vmem:[#allocation2 + $0x130] ss:$8 sps:$4 sm:$0xff]   ;;  %v2390_v5 = vld [vmem:[#allocation2 + $0x144] ss:$8 sps:$4 sm:$0xff]  }
  0x49   : > { %1077 = vmatprep.subr.bf16.mxu0 %v2381_v63  ;;  %v2388_v6 = vld [vmem:[#allocation2 + $0x140] ss:$8 sps:$4 sm:$0xff]   ;;  %v2393_v7 = vld [vmem:[#allocation2 + $0x154] ss:$8 sps:$4 sm:$0xff]   ;;  %v2391_v8 = vld [vmem:[#allocation2 + $0x150] ss:$8 sps:$4 sm:$0xff]  }
  0x4a   : > { %v2396_v9 = vld [vmem:[#allocation2 + $0x164] ss:$8 sps:$4 sm:$0xff]   ;;  %v2394_v10 = vld [vmem:[#allocation2 + $0x160] ss:$8 sps:$4 sm:$0xff]   ;;  %v2399_v11 = vld [vmem:[#allocation2 + $0x174] ss:$8 sps:$4 sm:$0xff]  }
  0x4b   : > { %719 = vmatpush1.bf16.msra.mxu1 %v2345_v27  ;;  %v2397_v12 = vld [vmem:[#allocation2 + $0x170] ss:$8 sps:$4 sm:$0xff]   ;;  %v2402_v13 = vld [vmem:[#allocation2 + $0x184] ss:$8 sps:$4 sm:$0xff]   ;;  %v2400_v14 = vld [vmem:[#allocation2 + $0x180] ss:$8 sps:$4 sm:$0xff]  }
  0x4c   : > { %720 = vmatprep.subr.bf16.mxu1 %v2346_v28  ;;  %v2405_v15 = vld [vmem:[#allocation2 + $0x194] ss:$8 sps:$4 sm:$0xff]   ;;  %v2403_v16 = vld [vmem:[#allocation2 + $0x190] ss:$8 sps:$4 sm:$0xff]   ;;  %v2408_v17 = vld [vmem:[#allocation2 + $0x1a4] ss:$8 sps:$4 sm:$0xff]  }
  0x4d   : > { %2129 = vmatmul.mubr.msk.bf16.gmra.mrb[8].mxu0 %vm310_vm1, %v286_v22  ;;  %v2406_v18 = vld [vmem:[#allocation2 + $0x1a0] ss:$8 sps:$4 sm:$0xff]   ;;  %v2411_v19 = vld [vmem:[#allocation2 + $0x1b4] ss:$8 sps:$4 sm:$0xff]   ;;  %v2409_v20 = vld [vmem:[#allocation2 + $0x1b0] ss:$8 sps:$4 sm:$0xff]   ;;  %v295_v22 = vlaneseq }
  0x4e   : > { %404 = vmatprep.mubr.bf16.mxu0 %v2621_v0  ;;  %v2414_v21 = vld [vmem:[#allocation2 + $0x1c4] ss:$8 sps:$4 sm:$0xff]   ;;  %v2412_v23 = vld [vmem:[#allocation2 + $0x1c0] ss:$8 sps:$4 sm:$0xff]   ;;  %v2417_v24 = vld [vmem:[#allocation2 + $0x1d4] ss:$8 sps:$4 sm:$0xff]  }
  0x4f   : > { %721 = vmatpush1.bf16.msra.mxu1 %v2348_v30  ;;  %v296_v25 = vshrl.u32 %v295_v22, 7  ;;  %v2415_v26 = vld [vmem:[#allocation2 + $0x1d0] ss:$8 sps:$4 sm:$0xff]   ;;  %v293_v28 = vld [vmem:[%s3054_s4] sm:$0x3] }
  0x50   : > { %722 = vmatprep.subr.bf16.mxu1 %v2349_v31 }
  0x51   : > { %v2783_v27 = vsub.s32 0, %v296_v25 }
  0x53   : > { %723 = vmatpush1.bf16.msra.mxu1 %v2351_v34  ;;  %v2791_v30 = vrot.slane %v293_v28, %v2783_v27 }
  0x54   : > { %724 = vmatprep.subr.bf16.mxu1 %v2352_v35 }
  0x55   : > { %2130 = vmatmul.mubr.msk.bf16.gmra.mrb[12].mxu0 %vm310_vm1, %v287_v29  ;;  %v2788_v29 = vsub.s32 1, %v296_v25 }
  0x56   : > { %414 = vmatprep.mubr.bf16.mxu0 %v2621_v0 }
  0x57   : > { %725 = vmatpush1.bf16.msra.mxu1 %v2354_v37  ;;  %v2794_v31 = vrot.slane %v293_v28, %v2788_v29 }
  0x58   : > { %726 = vmatprep.subr.bf16.mxu1 %v2355_v38 }
  0x5b   : > { %727 = vmatpush1.bf16.msra.mxu1 %v2357_v41 }
  0x5c   : > { %728 = vmatprep.subr.bf16.mxu1 %v2358_v42 }
  0x5d   : > { %2131 = vmatmul.mubr.msk.bf16.gmra.mrb[16].mxu0 %vm310_vm1, %v288_v36 }
  0x5e   : > { %424 = vmatprep.mubr.bf16.mxu0 %v2621_v0 }
  0x5f   : > { %729 = vmatpush1.bf16.msra.mxu1 %v2360_v44 }
  0x60   : > { %730 = vmatprep.subr.bf16.mxu1 %v2361_v45 }
  0x63   : > { %731 = vmatpush1.bf16.msra.mxu1 %v2363_v48 }
  0x64   : > { %732 = vmatprep.subr.bf16.mxu1 %v2364_v49 }
  0x65   : > { %2132 = vmatmul.mubr.msk.bf16.gmra.mrb[20].mxu0 %vm310_vm1, %v289_v43 }
  0x66   : > { %434 = vmatprep.mubr.bf16.mxu0 %v2621_v0 }
  0x67   : > { %733 = vmatpush1.bf16.msra.mxu1 %v2366_v51 }
  0x68   : > { %734 = vmatprep.subr.bf16.mxu1 %v2367_v52 }
  0x6b   : > { %735 = vmatpush1.bf16.msra.mxu1 %v2369_v56 }
  0x6c   : > { %736 = vmatprep.subr.bf16.mxu1 %v2370_v57 }
  0x6d   : > { %2133 = vmatmul.mubr.msk.bf16.gmra.mrb[24].mxu0 %vm310_vm1, %v290_v50 }
  0x6e   : > { %444 = vmatprep.mubr.bf16.mxu0 %v2621_v0  ;;  %v2379_v0 = vld [vmem:[#allocation2 + $0x110] ss:$8 sps:$4 sm:$0xff]  }
  0x6f   : > { %737 = vmatpush1.bf16.msra.mxu1 %v2372_v58  ;;  %1078 = vmatpush1.bf16.msra.mxu0 %v2379_v0 }
  0x70   : > { %738 = vmatprep.subr.bf16.mxu1 %v2373_v59  ;;  %1079 = vmatprep.subr.bf16.mxu0 %v2384_v1 }
  0x73   : > { %739 = vmatpush1.bf16.msra.mxu1 %v2375_v60  ;;  %1080 = vmatpush1.bf16.msra.mxu0 %v2382_v2 }
  0x74   : > { %1081 = vmatprep.subr.bf16.mxu0 %v2387_v3 }
  0x75   : > { %2134 = vmatmul.mubr.msk.bf16.gmra.mrb[28].mxu0 %vm310_vm1, %v291_v55 }
  0x77   : > { %1082 = vmatpush1.bf16.msra.mxu0 %v2385_v4 }
  0x78   : > { %1083 = vmatprep.subr.bf16.mxu0 %v2390_v5 }
  0x7b   : > { %1084 = vmatpush1.bf16.msra.mxu0 %v2388_v6 }
  0x7c   : > { %1085 = vmatprep.subr.bf16.mxu0 %v2393_v7 }
  0x7f   : > { %1086 = vmatpush1.bf16.msra.mxu0 %v2391_v8 }
  0x80   : > { %1087 = vmatprep.subr.bf16.mxu0 %v2396_v9 }
  0x83   : > { %1088 = vmatpush1.bf16.msra.mxu0 %v2394_v10 }
  0x84   : > { %1089 = vmatprep.subr.bf16.mxu0 %v2399_v11 }
  0x87   : > { %1090 = vmatpush1.bf16.msra.mxu0 %v2397_v12 }
  0x88   : > { %1091 = vmatprep.subr.bf16.mxu0 %v2402_v13 }
  0x8b   : > { %1092 = vmatpush1.bf16.msra.mxu0 %v2400_v14 }
  0x8c   : > { %1093 = vmatprep.subr.bf16.mxu0 %v2405_v15 }
  0x8f   : > { %1094 = vmatpush1.bf16.msra.mxu0 %v2403_v16 }
  0x90   : > { %1095 = vmatprep.subr.bf16.mxu0 %v2408_v17 }
  0x93   : > { %1096 = vmatpush1.bf16.msra.mxu0 %v2406_v18 }
  0x94   : > { %1097 = vmatprep.subr.bf16.mxu0 %v2411_v19 }
  0x97   : > { %1098 = vmatpush1.bf16.msra.mxu0 %v2409_v20 }
  0x98   : > { %1099 = vmatprep.subr.bf16.mxu0 %v2414_v21 }
  0x9b   : > { %1100 = vmatpush1.bf16.msra.mxu0 %v2412_v23 }
  0x9c   : > { %1101 = vmatprep.subr.bf16.mxu0 %v2417_v24 }
  0x9f   : > { %1102 = vmatpush1.bf16.msra.mxu0 %v2415_v26 }
 0x110   : > { %v376_v32 = vpop.f32.mrb[0].mxu0 }
 0x111   : > { %v377_v33 = vadd.f32 %v376_v32, %v2791_v30  ;;  %v378_v34 = vpop.f32.mrb[1].mxu0 }
 0x112   : > { %v379_v35 = vadd.f32 %v378_v34, %v2794_v31  ;;  %v380_v36 = vpop.f32.mrb[2].mxu0 }
 0x113   : > { %v381_v37 = vadd.f32 %v380_v36, %v2791_v30  ;;  %v382_v38 = vpop.f32.mrb[3].mxu0  ;;  %v455_v40 = vmax.f32 %v377_v33, 0.0 }
 0x114   : > { %v383_v39 = vadd.f32 %v382_v38, %v2794_v31  ;;  %v456_v42 = vmax.f32 %v379_v35, 0.0 }
 0x115   : > { %v457_v41 = vmax.f32 %v381_v37, 0.0 }
 0x116   : > { %v458_v43 = vmax.f32 %v383_v39, 0.0 }
 0x117   : > { %v487_v44 = vpack.c.bf16 %v457_v41, %v455_v40 }
 0x118   : > { %v386_v45 = vpop.f32.mrb[4].mxu0  ;;  %v488_v46 = vpack.c.bf16 %v458_v43, %v456_v42 }
 0x119   : > { %v387_v47 = vadd.f32 %v386_v45, %v2791_v30  ;;  %v388_v48 = vpop.f32.mrb[5].mxu0 }
 0x11a   : > { %v389_v49 = vadd.f32 %v388_v48, %v2794_v31  ;;  %v390_v50 = vpop.f32.mrb[6].mxu0  ;;  %740 = vmatprep.mubr.bf16.mxu1 %v488_v46 }
 0x11b   : > { %v391_v51 = vadd.f32 %v390_v50, %v2791_v30  ;;  %v392_v52 = vpop.f32.mrb[7].mxu0  ;;  %741 = vmatmul.mubr.bf16.vlgmr.msra.gmra.mrb[0].mxu1 %v487_v44  ;;  %v459_v54 = vmax.f32 %v387_v47, 0.0 }
 0x11c   : > { %v393_v53 = vadd.f32 %v392_v52, %v2794_v31  ;;  %v460_v56 = vmax.f32 %v389_v49, 0.0 }
 0x11d   : > { %v461_v55 = vmax.f32 %v391_v51, 0.0 }
 0x11e   : > { %v462_v57 = vmax.f32 %v393_v53, 0.0 }
 0x11f   : > { %v489_v58 = vpack.c.bf16 %v461_v55, %v459_v54 }
 0x120   : > { %v490_v59 = vpack.c.bf16 %v462_v57, %v460_v56  ;;  %v396_v60 = vpop.f32.mrb[8].mxu0 }
 0x121   : > { %v397_v61 = vadd.f32 %v396_v60, %v2791_v30  ;;  %v398_v62 = vpop.f32.mrb[9].mxu0 }
 0x122   : > { %v399_v63 = vadd.f32 %v398_v62, %v2794_v31  ;;  %v400_v0 = vpop.f32.mrb[10].mxu0  ;;  %750 = vmatprep.mubr.bf16.mxu1 %v490_v59 }
 0x123   : > { %v401_v1 = vadd.f32 %v400_v0, %v2791_v30  ;;  %v402_v2 = vpop.f32.mrb[11].mxu0  ;;  %751 = vmatmul.mubr.bf16.gmra.mrb[4].mxu1 %v489_v58  ;;  %v463_v4 = vmax.f32 %v397_v61, 0.0 }
 0x124   : > { %v403_v3 = vadd.f32 %v402_v2, %v2794_v31  ;;  %v464_v6 = vmax.f32 %v399_v63, 0.0 }
 0x125   : > { %v465_v5 = vmax.f32 %v401_v1, 0.0 }
 0x126   : > { %v466_v7 = vmax.f32 %v403_v3, 0.0 }
 0x127   : > { %v491_v8 = vpack.c.bf16 %v465_v5, %v463_v4 }
 0x128   : > { %v492_v9 = vpack.c.bf16 %v466_v7, %v464_v6  ;;  %v406_v10 = vpop.f32.mrb[12].mxu0 }
 0x129   : > { %v407_v11 = vadd.f32 %v406_v10, %v2791_v30  ;;  %v408_v12 = vpop.f32.mrb[13].mxu0 }
 0x12a   : > { %v409_v13 = vadd.f32 %v408_v12, %v2794_v31  ;;  %v410_v14 = vpop.f32.mrb[14].mxu0  ;;  %760 = vmatprep.mubr.bf16.mxu1 %v492_v9 }
 0x12b   : > { %v411_v15 = vadd.f32 %v410_v14, %v2791_v30  ;;  %v412_v16 = vpop.f32.mrb[15].mxu0  ;;  %761 = vmatmul.mubr.bf16.gmra.mrb[8].mxu1 %v491_v8  ;;  %v467_v18 = vmax.f32 %v407_v11, 0.0 }
 0x12c   : > { %v413_v17 = vadd.f32 %v412_v16, %v2794_v31  ;;  %v468_v20 = vmax.f32 %v409_v13, 0.0 }
 0x12d   : > { %v469_v19 = vmax.f32 %v411_v15, 0.0 }
 0x12e   : > { %v470_v21 = vmax.f32 %v413_v17, 0.0 }
 0x12f   : > { %v493_v22 = vpack.c.bf16 %v469_v19, %v467_v18 }
 0x130   : > { %v494_v23 = vpack.c.bf16 %v470_v21, %v468_v20  ;;  %v416_v24 = vpop.f32.mrb[16].mxu0  ;;  %v2420_v20 = vld [vmem:[#allocation2 + $0x1e4] ss:$8 sps:$4 sm:$0xff]   ;;  %v2418_v21 = vld [vmem:[#allocation2 + $0x1e0] ss:$8 sps:$4 sm:$0xff]  }
 0x131   : > { %v417_v25 = vadd.f32 %v416_v24, %v2791_v30  ;;  %v418_v26 = vpop.f32.mrb[17].mxu0  ;;  %1103 = vmatprep.subr.bf16.mxu0 %v2420_v20  ;;  %v2426_v24 = vld [vmem:[#allocation2 + $0x204] ss:$8 sps:$4 sm:$0xff]  }
 0x132   : > { %v419_v28 = vadd.f32 %v418_v26, %v2794_v31  ;;  %v420_v32 = vpop.f32.mrb[18].mxu0  ;;  %770 = vmatprep.mubr.bf16.mxu1 %v494_v23  ;;  %1104 = vmatpush1.bf16.msra.mxu0 %v2418_v21  ;;  %v2421_v23 = vld [vmem:[#allocation2 + $0x1f0] ss:$8 sps:$4 sm:$0xff]   ;;  %v2432_v26 = vld [vmem:[#allocation2 + $0x224] ss:$8 sps:$4 sm:$0xff]  }
 0x133   : > { %v421_v33 = vadd.f32 %v420_v32, %v2791_v30  ;;  %v422_v34 = vpop.f32.mrb[19].mxu0  ;;  %771 = vmatmul.mubr.bf16.gmra.mrb[12].mxu1 %v493_v22  ;;  %v471_v36 = vmax.f32 %v417_v25, 0.0  ;;  %v2423_v22 = vld [vmem:[#allocation2 + $0x1f4] ss:$8 sps:$4 sm:$0xff]   ;;  %1442 = vmatprep.subr.bf16.mxu1 %v2426_v24 }
 0x134   : > { %v423_v35 = vadd.f32 %v422_v34, %v2794_v31  ;;  %v472_v38 = vmax.f32 %v419_v28, 0.0  ;;  %1105 = vmatprep.subr.bf16.mxu0 %v2423_v22  ;;  %v2429_v25 = vld [vmem:[#allocation2 + $0x214] ss:$8 sps:$4 sm:$0xff]   ;;  %v2430_v28 = vld [vmem:[#allocation2 + $0x220] ss:$8 sps:$4 sm:$0xff]  }
 0x135   : > { %v473_v37 = vmax.f32 %v421_v33, 0.0  ;;  %v2435_v32 = vld [vmem:[#allocation2 + $0x234] ss:$8 sps:$4 sm:$0xff]   ;;  %v2433_v33 = vld [vmem:[#allocation2 + $0x230] ss:$8 sps:$4 sm:$0xff]  }
 0x136   : > { %v474_v39 = vmax.f32 %v423_v35, 0.0  ;;  %1106 = vmatpush1.bf16.msra.mxu0 %v2421_v23  ;;  %v2438_v34 = vld [vmem:[#allocation2 + $0x244] ss:$8 sps:$4 sm:$0xff]   ;;  %v2436_v35 = vld [vmem:[#allocation2 + $0x240] ss:$8 sps:$4 sm:$0xff]  }
 0x137   : > { %v495_v40 = vpack.c.bf16 %v473_v37, %v471_v36  ;;  %v2441_v36 = vld [vmem:[#allocation2 + $0x254] ss:$8 sps:$4 sm:$0xff]   ;;  %v2439_v37 = vld [vmem:[#allocation2 + $0x250] ss:$8 sps:$4 sm:$0xff]  }
 0x138   : > { %v496_v41 = vpack.c.bf16 %v474_v39, %v472_v38  ;;  %v426_v42 = vpop.f32.mrb[20].mxu0  ;;  %v2444_v38 = vld [vmem:[#allocation2 + $0x264] ss:$8 sps:$4 sm:$0xff]   ;;  %v2442_v39 = vld [vmem:[#allocation2 + $0x260] ss:$8 sps:$4 sm:$0xff]  }
 0x139   : > { %v427_v43 = vadd.f32 %v426_v42, %v2791_v30  ;;  %v428_v44 = vpop.f32.mrb[21].mxu0  ;;  %v2450_v42 = vld [vmem:[#allocation2 + $0x284] ss:$8 sps:$4 sm:$0xff]  }
 0x13a   : > { %v429_v45 = vadd.f32 %v428_v44, %v2794_v31  ;;  %v430_v46 = vpop.f32.mrb[22].mxu0  ;;  %780 = vmatprep.mubr.bf16.mxu1 %v496_v41  ;;  %v2445_v41 = vld [vmem:[#allocation2 + $0x270] ss:$8 sps:$4 sm:$0xff]   ;;  %v2453_v44 = vld [vmem:[#allocation2 + $0x294] ss:$8 sps:$4 sm:$0xff]  }
 0x13b   : > { %v431_v47 = vadd.f32 %v430_v46, %v2791_v30  ;;  %v432_v48 = vpop.f32.mrb[23].mxu0  ;;  %781 = vmatmul.mubr.bf16.gmra.mrb[16].mxu1 %v495_v40  ;;  %v475_v50 = vmax.f32 %v427_v43, 0.0  ;;  %v2447_v40 = vld [vmem:[#allocation2 + $0x274] ss:$8 sps:$4 sm:$0xff]   ;;  %v2448_v43 = vld [vmem:[#allocation2 + $0x280] ss:$8 sps:$4 sm:$0xff]  }
 0x13c   : > { %v433_v49 = vadd.f32 %v432_v48, %v2794_v31  ;;  %v476_v52 = vmax.f32 %v429_v45, 0.0  ;;  %v2451_v45 = vld [vmem:[#allocation2 + $0x290] ss:$8 sps:$4 sm:$0xff]   ;;  %v2456_v46 = vld [vmem:[#allocation2 + $0x2a4] ss:$8 sps:$4 sm:$0xff]  }
 0x13d   : > { %v477_v51 = vmax.f32 %v431_v47, 0.0  ;;  %v2454_v47 = vld [vmem:[#allocation2 + $0x2a0] ss:$8 sps:$4 sm:$0xff]   ;;  %v2459_v48 = vld [vmem:[#allocation2 + $0x2b4] ss:$8 sps:$4 sm:$0xff]  }
 0x13e   : > { %v478_v53 = vmax.f32 %v433_v49, 0.0  ;;  %v2457_v49 = vld [vmem:[#allocation2 + $0x2b0] ss:$8 sps:$4 sm:$0xff]  }
 0x13f   : > { %v497_v54 = vpack.c.bf16 %v477_v51, %v475_v50  ;;  %v2462_v50 = vld [vmem:[#allocation2 + $0x2c4] ss:$8 sps:$4 sm:$0xff]   ;;  %v2460_v51 = vld [vmem:[#allocation2 + $0x2c0] ss:$8 sps:$4 sm:$0xff]  }
 0x140   : > { %v498_v55 = vpack.c.bf16 %v478_v53, %v476_v52  ;;  %v436_v56 = vpop.f32.mrb[24].mxu0  ;;  %v2465_v52 = vld [vmem:[#allocation2 + $0x2d4] ss:$8 sps:$4 sm:$0xff]   ;;  %v2463_v53 = vld [vmem:[#allocation2 + $0x2d0] ss:$8 sps:$4 sm:$0xff]  }
 0x141   : > { %v437_v57 = vadd.f32 %v436_v56, %v2791_v30  ;;  %v438_v58 = vpop.f32.mrb[25].mxu0 }
 0x142   : > { %v439_v59 = vadd.f32 %v438_v58, %v2794_v31  ;;  %v440_v60 = vpop.f32.mrb[26].mxu0  ;;  %790 = vmatprep.mubr.bf16.mxu1 %v498_v55 }
 0x143   : > { %v441_v61 = vadd.f32 %v440_v60, %v2791_v30  ;;  %v442_v62 = vpop.f32.mrb[27].mxu0  ;;  %791 = vmatmul.mubr.bf16.gmra.mrb[20].mxu1 %v497_v54  ;;  %v479_v0 = vmax.f32 %v437_v57, 0.0  ;;  %v2135_v54 = vld [vmem:[%s3054_s4 + $0x2] sm:$0x3] }
 0x144   : > { %v443_v63 = vadd.f32 %v442_v62, %v2794_v31  ;;  %v480_v2 = vmax.f32 %v439_v59, 0.0  ;;  %v2832_v55 = vrot.slane %v2135_v54, %v2783_v27  ;;  %v2835_v56 = vrot.slane %v2135_v54, %v2788_v29 }
 0x145   : > { %v481_v1 = vmax.f32 %v441_v61, 0.0 }
 0x146   : > { %v482_v3 = vmax.f32 %v443_v63, 0.0 }
 0x147   : > { %v499_v4 = vpack.c.bf16 %v481_v1, %v479_v0 }
 0x148   : > { %v500_v5 = vpack.c.bf16 %v482_v3, %v480_v2  ;;  %v446_v6 = vpop.f32.mrb[28].mxu0 }
 0x149   : > { %v447_v7 = vadd.f32 %v446_v6, %v2791_v30  ;;  %v448_v8 = vpop.f32.mrb[29].mxu0 }
 0x14a   : > { %v449_v9 = vadd.f32 %v448_v8, %v2794_v31  ;;  %v450_v10 = vpop.f32.mrb[30].mxu0  ;;  %800 = vmatprep.mubr.bf16.mxu1 %v500_v5 }
 0x14b   : > { %v451_v11 = vadd.f32 %v450_v10, %v2791_v30  ;;  %v452_v12 = vpop.f32.mrb[31].mxu0  ;;  %801 = vmatmul.mubr.bf16.gmra.mrb[24].mxu1 %v499_v4  ;;  %v483_v14 = vmax.f32 %v447_v7, 0.0  ;;  %v2424_v30 = vld [vmem:[#allocation2 + $0x200] ss:$8 sps:$4 sm:$0xff]  }
 0x14c   : > { %v453_v13 = vadd.f32 %v452_v12, %v2794_v31  ;;  %v484_v16 = vmax.f32 %v449_v9, 0.0  ;;  %1443 = vmatpush1.bf16.msra.mxu1 %v2424_v30  ;;  %v2427_v31 = vld [vmem:[#allocation2 + $0x210] ss:$8 sps:$4 sm:$0xff]  }
 0x14d   : > { %v485_v15 = vmax.f32 %v451_v11, 0.0  ;;  %1444 = vmatprep.subr.bf16.mxu1 %v2429_v25 }
 0x14e   : > { %v486_v17 = vmax.f32 %v453_v13, 0.0 }
 0x14f   : > { %v501_v18 = vpack.c.bf16 %v485_v15, %v483_v14 }
 0x150   : > { %v502_v19 = vpack.c.bf16 %v486_v17, %v484_v16  ;;  %1445 = vmatpush1.bf16.msra.mxu1 %v2427_v31 }
 0x151   : > { %1446 = vmatprep.subr.bf16.mxu1 %v2432_v26 }
 0x152   : > { %810 = vmatprep.mubr.bf16.mxu1 %v502_v19 }
 0x153   : > { %811 = vmatmul.mubr.bf16.gmra.mrb[28].mxu1 %v501_v18 }
 0x154   : > { %1447 = vmatpush1.bf16.msra.mxu1 %v2430_v28 }
 0x155   : > { %1448 = vmatprep.subr.bf16.mxu1 %v2435_v32 }
 0x158   : > { %1449 = vmatpush1.bf16.msra.mxu1 %v2433_v33 }
 0x159   : > { %1450 = vmatprep.subr.bf16.mxu1 %v2438_v34 }
 0x15c   : > { %1451 = vmatpush1.bf16.msra.mxu1 %v2436_v35 }
 0x15d   : > { %1452 = vmatprep.subr.bf16.mxu1 %v2441_v36 }
 0x160   : > { %1453 = vmatpush1.bf16.msra.mxu1 %v2439_v37 }
 0x161   : > { %1454 = vmatprep.subr.bf16.mxu1 %v2444_v38 }
 0x164   : > { %1455 = vmatpush1.bf16.msra.mxu1 %v2442_v39 }
 0x165   : > { %1456 = vmatprep.subr.bf16.mxu1 %v2447_v40 }
 0x168   : > { %1457 = vmatpush1.bf16.msra.mxu1 %v2445_v41 }
 0x169   : > { %1458 = vmatprep.subr.bf16.mxu1 %v2450_v42 }
 0x16c   : > { %1459 = vmatpush1.bf16.msra.mxu1 %v2448_v43 }
 0x16d   : > { %1460 = vmatprep.subr.bf16.mxu1 %v2453_v44 }
 0x170   : > { %1461 = vmatpush1.bf16.msra.mxu1 %v2451_v45 }
 0x171   : > { %1462 = vmatprep.subr.bf16.mxu1 %v2456_v46 }
 0x174   : > { %1463 = vmatpush1.bf16.msra.mxu1 %v2454_v47 }
 0x175   : > { %1464 = vmatprep.subr.bf16.mxu1 %v2459_v48 }
 0x178   : > { %1465 = vmatpush1.bf16.msra.mxu1 %v2457_v49 }
 0x179   : > { %1466 = vmatprep.subr.bf16.mxu1 %v2462_v50 }
 0x17c   : > { %1467 = vmatpush1.bf16.msra.mxu1 %v2460_v51 }
 0x17d   : > { %1468 = vmatprep.subr.bf16.mxu1 %v2465_v52 }
 0x180   : > { %1469 = vmatpush1.bf16.msra.mxu1 %v2463_v53 }
 0x1ee   : > { %v742_v57 = vpop.f32.mrb[0].mxu1 }
 0x1ef   : > { %v743_v58 = vadd.f32 %v742_v57, %v2832_v55  ;;  %v744_v59 = vpop.f32.mrb[1].mxu1 }
 0x1f0   : > { %v745_v60 = vadd.f32 %v744_v59, %v2835_v56  ;;  %v746_v61 = vpop.f32.mrb[2].mxu1 }
 0x1f1   : > { %v747_v62 = vadd.f32 %v746_v61, %v2832_v55  ;;  %v748_v63 = vpop.f32.mrb[3].mxu1  ;;  %v821_v1 = vmax.f32 %v743_v58, 0.0 }
 0x1f2   : > { %v749_v0 = vadd.f32 %v748_v63, %v2835_v56  ;;  %v822_v3 = vmax.f32 %v745_v60, 0.0 }
 0x1f3   : > { %v823_v2 = vmax.f32 %v747_v62, 0.0 }
 0x1f4   : > { %v824_v4 = vmax.f32 %v749_v0, 0.0 }
 0x1f5   : > { %v853_v5 = vpack.c.bf16 %v823_v2, %v821_v1 }
 0x1f6   : > { %v854_v6 = vpack.c.bf16 %v824_v4, %v822_v3  ;;  %v752_v7 = vpop.f32.mrb[4].mxu1 }
 0x1f7   : > { %v753_v8 = vadd.f32 %v752_v7, %v2832_v55  ;;  %v754_v9 = vpop.f32.mrb[5].mxu1 }
 0x1f8   : > { %v755_v10 = vadd.f32 %v754_v9, %v2835_v56  ;;  %v756_v11 = vpop.f32.mrb[6].mxu1  ;;  %1107 = vmatprep.mubr.bf16.mxu0 %v854_v6 }
 0x1f9   : > { %v757_v12 = vadd.f32 %v756_v11, %v2832_v55  ;;  %v758_v13 = vpop.f32.mrb[7].mxu1  ;;  %1108 = vmatmul.mubr.bf16.vlgmr.msra.gmra.mrb[32].mxu0 %v853_v5  ;;  %v825_v15 = vmax.f32 %v753_v8, 0.0 }
 0x1fa   : > { %v759_v14 = vadd.f32 %v758_v13, %v2835_v56  ;;  %v826_v17 = vmax.f32 %v755_v10, 0.0 }
 0x1fb   : > { %v827_v16 = vmax.f32 %v757_v12, 0.0 }
 0x1fc   : > { %v828_v18 = vmax.f32 %v759_v14, 0.0 }
 0x1fd   : > { %v855_v19 = vpack.c.bf16 %v827_v16, %v825_v15 }
 0x1fe   : > { %v856_v20 = vpack.c.bf16 %v828_v18, %v826_v17  ;;  %v762_v21 = vpop.f32.mrb[8].mxu1 }
 0x1ff   : > { %v763_v22 = vadd.f32 %v762_v21, %v2832_v55  ;;  %v764_v23 = vpop.f32.mrb[9].mxu1 }
 0x200   : > { %v765_v30 = vadd.f32 %v764_v23, %v2835_v56  ;;  %v766_v24 = vpop.f32.mrb[10].mxu1  ;;  %1117 = vmatprep.mubr.bf16.mxu0 %v856_v20 }
 0x201   : > { %v767_v25 = vadd.f32 %v766_v24, %v2832_v55  ;;  %v768_v31 = vpop.f32.mrb[11].mxu1  ;;  %1118 = vmatmul.mubr.bf16.gmra.mrb[36].mxu0 %v855_v19  ;;  %v829_v28 = vmax.f32 %v763_v22, 0.0 }
 0x202   : > { %v769_v26 = vadd.f32 %v768_v31, %v2835_v56  ;;  %v830_v33 = vmax.f32 %v765_v30, 0.0 }
 0x203   : > { %v831_v32 = vmax.f32 %v767_v25, 0.0 }
 0x204   : > { %v832_v34 = vmax.f32 %v769_v26, 0.0 }
 0x205   : > { %v857_v35 = vpack.c.bf16 %v831_v32, %v829_v28 }
 0x206   : > { %v858_v36 = vpack.c.bf16 %v832_v34, %v830_v33  ;;  %v772_v37 = vpop.f32.mrb[12].mxu1 }
 0x207   : > { %v773_v38 = vadd.f32 %v772_v37, %v2832_v55  ;;  %v774_v39 = vpop.f32.mrb[13].mxu1 }
 0x208   : > { %v775_v40 = vadd.f32 %v774_v39, %v2835_v56  ;;  %v776_v41 = vpop.f32.mrb[14].mxu1  ;;  %1127 = vmatprep.mubr.bf16.mxu0 %v858_v36 }
 0x209   : > { %v777_v42 = vadd.f32 %v776_v41, %v2832_v55  ;;  %v778_v43 = vpop.f32.mrb[15].mxu1  ;;  %1128 = vmatmul.mubr.bf16.gmra.mrb[40].mxu0 %v857_v35  ;;  %v833_v45 = vmax.f32 %v773_v38, 0.0 }
 0x20a   : > { %v779_v44 = vadd.f32 %v778_v43, %v2835_v56  ;;  %v834_v47 = vmax.f32 %v775_v40, 0.0 }
 0x20b   : > { %v835_v46 = vmax.f32 %v777_v42, 0.0 }
 0x20c   : > { %v836_v48 = vmax.f32 %v779_v44, 0.0 }
 0x20d   : > { %v859_v49 = vpack.c.bf16 %v835_v46, %v833_v45 }
 0x20e   : > { %v860_v50 = vpack.c.bf16 %v836_v48, %v834_v47  ;;  %v782_v51 = vpop.f32.mrb[16].mxu1  ;;  %v2468_v47 = vld [vmem:[#allocation2 + $0x2e4] ss:$8 sps:$4 sm:$0xff]   ;;  %v2466_v48 = vld [vmem:[#allocation2 + $0x2e0] ss:$8 sps:$4 sm:$0xff]  }
 0x20f   : > { %v783_v52 = vadd.f32 %v782_v51, %v2832_v55  ;;  %v784_v53 = vpop.f32.mrb[17].mxu1  ;;  %1470 = vmatprep.subr.bf16.mxu1 %v2468_v47  ;;  %v2474_v51 = vld [vmem:[#allocation2 + $0x304] ss:$8 sps:$4 sm:$0xff]  }
 0x210   : > { %v785_v54 = vadd.f32 %v784_v53, %v2835_v56  ;;  %v786_v57 = vpop.f32.mrb[18].mxu1  ;;  %1137 = vmatprep.mubr.bf16.mxu0 %v860_v50  ;;  %1471 = vmatpush1.bf16.msra.mxu1 %v2466_v48  ;;  %v2469_v50 = vld [vmem:[#allocation2 + $0x2f0] ss:$8 sps:$4 sm:$0xff]   ;;  %v2480_v53 = vld [vmem:[#allocation2 + $0x324] ss:$8 sps:$4 sm:$0xff]  }
 0x211   : > { %v787_v58 = vadd.f32 %v786_v57, %v2832_v55  ;;  %v788_v59 = vpop.f32.mrb[19].mxu1  ;;  %1138 = vmatmul.mubr.bf16.gmra.mrb[44].mxu0 %v859_v49  ;;  %v837_v61 = vmax.f32 %v783_v52, 0.0  ;;  %v2471_v49 = vld [vmem:[#allocation2 + $0x2f4] ss:$8 sps:$4 sm:$0xff]   ;;  %1809 = vmatprep.subr.bf16.mxu0 %v2474_v51 }
 0x212   : > { %v789_v60 = vadd.f32 %v788_v59, %v2835_v56  ;;  %v838_v63 = vmax.f32 %v785_v54, 0.0  ;;  %1472 = vmatprep.subr.bf16.mxu1 %v2471_v49  ;;  %v2477_v52 = vld [vmem:[#allocation2 + $0x314] ss:$8 sps:$4 sm:$0xff]   ;;  %v2478_v54 = vld [vmem:[#allocation2 + $0x320] ss:$8 sps:$4 sm:$0xff]  }
 0x213   : > { %v839_v62 = vmax.f32 %v787_v58, 0.0  ;;  %v2483_v57 = vld [vmem:[#allocation2 + $0x334] ss:$8 sps:$4 sm:$0xff]   ;;  %v2481_v58 = vld [vmem:[#allocation2 + $0x330] ss:$8 sps:$4 sm:$0xff]  }
 0x214   : > { %v840_v0 = vmax.f32 %v789_v60, 0.0  ;;  %1473 = vmatpush1.bf16.msra.mxu1 %v2469_v50  ;;  %v2486_v59 = vld [vmem:[#allocation2 + $0x344] ss:$8 sps:$4 sm:$0xff]   ;;  %v2484_v60 = vld [vmem:[#allocation2 + $0x340] ss:$8 sps:$4 sm:$0xff]  }
 0x215   : > { %v861_v1 = vpack.c.bf16 %v839_v62, %v837_v61  ;;  %v2489_v61 = vld [vmem:[#allocation2 + $0x354] ss:$8 sps:$4 sm:$0xff]   ;;  %v2487_v62 = vld [vmem:[#allocation2 + $0x350] ss:$8 sps:$4 sm:$0xff]  }
 0x216   : > { %v862_v2 = vpack.c.bf16 %v840_v0, %v838_v63  ;;  %v792_v3 = vpop.f32.mrb[20].mxu1  ;;  %v2492_v63 = vld [vmem:[#allocation2 + $0x364] ss:$8 sps:$4 sm:$0xff]   ;;  %v2490_v0 = vld [vmem:[#allocation2 + $0x360] ss:$8 sps:$4 sm:$0xff]  }
 0x217   : > { %v793_v4 = vadd.f32 %v792_v3, %v2832_v55  ;;  %v794_v5 = vpop.f32.mrb[21].mxu1  ;;  %v2498_v3 = vld [vmem:[#allocation2 + $0x384] ss:$8 sps:$4 sm:$0xff]  }
 0x218   : > { %v795_v6 = vadd.f32 %v794_v5, %v2835_v56  ;;  %v796_v7 = vpop.f32.mrb[22].mxu1  ;;  %1147 = vmatprep.mubr.bf16.mxu0 %v862_v2  ;;  %v2493_v2 = vld [vmem:[#allocation2 + $0x370] ss:$8 sps:$4 sm:$0xff]   ;;  %v2501_v5 = vld [vmem:[#allocation2 + $0x394] ss:$8 sps:$4 sm:$0xff]  }
 0x219   : > { %v797_v8 = vadd.f32 %v796_v7, %v2832_v55  ;;  %v798_v9 = vpop.f32.mrb[23].mxu1  ;;  %1148 = vmatmul.mubr.bf16.gmra.mrb[48].mxu0 %v861_v1  ;;  %v841_v11 = vmax.f32 %v793_v4, 0.0  ;;  %v2495_v1 = vld [vmem:[#allocation2 + $0x374] ss:$8 sps:$4 sm:$0xff]   ;;  %v2496_v4 = vld [vmem:[#allocation2 + $0x380] ss:$8 sps:$4 sm:$0xff]  }
 0x21a   : > { %v799_v10 = vadd.f32 %v798_v9, %v2835_v56  ;;  %v842_v13 = vmax.f32 %v795_v6, 0.0  ;;  %v2499_v6 = vld [vmem:[#allocation2 + $0x390] ss:$8 sps:$4 sm:$0xff]   ;;  %v2504_v7 = vld [vmem:[#allocation2 + $0x3a4] ss:$8 sps:$4 sm:$0xff]  }
 0x21b   : > { %v843_v12 = vmax.f32 %v797_v8, 0.0  ;;  %v2502_v8 = vld [vmem:[#allocation2 + $0x3a0] ss:$8 sps:$4 sm:$0xff]   ;;  %v2507_v9 = vld [vmem:[#allocation2 + $0x3b4] ss:$8 sps:$4 sm:$0xff]  }
 0x21c   : > { %v844_v14 = vmax.f32 %v799_v10, 0.0  ;;  %v2505_v10 = vld [vmem:[#allocation2 + $0x3b0] ss:$8 sps:$4 sm:$0xff]  }
 0x21d   : > { %v863_v15 = vpack.c.bf16 %v843_v12, %v841_v11  ;;  %v2510_v11 = vld [vmem:[#allocation2 + $0x3c4] ss:$8 sps:$4 sm:$0xff]   ;;  %v2508_v12 = vld [vmem:[#allocation2 + $0x3c0] ss:$8 sps:$4 sm:$0xff]  }
 0x21e   : > { %v864_v16 = vpack.c.bf16 %v844_v14, %v842_v13  ;;  %v802_v17 = vpop.f32.mrb[24].mxu1  ;;  %v2513_v13 = vld [vmem:[#allocation2 + $0x3d4] ss:$8 sps:$4 sm:$0xff]   ;;  %v2511_v14 = vld [vmem:[#allocation2 + $0x3d0] ss:$8 sps:$4 sm:$0xff]  }
 0x21f   : > { %v803_v18 = vadd.f32 %v802_v17, %v2832_v55  ;;  %v804_v19 = vpop.f32.mrb[25].mxu1 }
 0x220   : > { %v805_v20 = vadd.f32 %v804_v19, %v2835_v56  ;;  %v806_v21 = vpop.f32.mrb[26].mxu1  ;;  %1157 = vmatprep.mubr.bf16.mxu0 %v864_v16 }
 0x221   : > { %v807_v22 = vadd.f32 %v806_v21, %v2832_v55  ;;  %v808_v23 = vpop.f32.mrb[27].mxu1  ;;  %1158 = vmatmul.mubr.bf16.gmra.mrb[52].mxu0 %v863_v15  ;;  %v845_v24 = vmax.f32 %v803_v18, 0.0  ;;  %v2168_v15 = vld [vmem:[%s3054_s4 + $0x4] sm:$0x3] }
 0x222   : > { %v809_v30 = vadd.f32 %v808_v23, %v2835_v56  ;;  %v846_v31 = vmax.f32 %v805_v20, 0.0  ;;  %v2873_v16 = vrot.slane %v2168_v15, %v2783_v27  ;;  %v2876_v17 = vrot.slane %v2168_v15, %v2788_v29 }
 0x223   : > { %v847_v25 = vmax.f32 %v807_v22, 0.0 }
 0x224   : > { %v848_v26 = vmax.f32 %v809_v30, 0.0 }
 0x225   : > { %v865_v28 = vpack.c.bf16 %v847_v25, %v845_v24 }
 0x226   : > { %v866_v32 = vpack.c.bf16 %v848_v26, %v846_v31  ;;  %v812_v33 = vpop.f32.mrb[28].mxu1 }
 0x227   : > { %v813_v34 = vadd.f32 %v812_v33, %v2832_v55  ;;  %v814_v35 = vpop.f32.mrb[29].mxu1 }
 0x228   : > { %v815_v36 = vadd.f32 %v814_v35, %v2835_v56  ;;  %v816_v37 = vpop.f32.mrb[30].mxu1  ;;  %1167 = vmatprep.mubr.bf16.mxu0 %v866_v32 }
 0x229   : > { %v817_v38 = vadd.f32 %v816_v37, %v2832_v55  ;;  %v818_v39 = vpop.f32.mrb[31].mxu1  ;;  %1168 = vmatmul.mubr.bf16.gmra.mrb[56].mxu0 %v865_v28  ;;  %v849_v41 = vmax.f32 %v813_v34, 0.0  ;;  %v2472_v55 = vld [vmem:[#allocation2 + $0x300] ss:$8 sps:$4 sm:$0xff]  }
 0x22a   : > { %v819_v40 = vadd.f32 %v818_v39, %v2835_v56  ;;  %v850_v43 = vmax.f32 %v815_v36, 0.0  ;;  %1810 = vmatpush1.bf16.msra.mxu0 %v2472_v55  ;;  %v2475_v56 = vld [vmem:[#allocation2 + $0x310] ss:$8 sps:$4 sm:$0xff]  }
 0x22b   : > { %v851_v42 = vmax.f32 %v817_v38, 0.0  ;;  %1811 = vmatprep.subr.bf16.mxu0 %v2477_v52 }
 0x22c   : > { %v852_v44 = vmax.f32 %v819_v40, 0.0 }
 0x22d   : > { %v867_v45 = vpack.c.bf16 %v851_v42, %v849_v41 }
 0x22e   : > { %v868_v46 = vpack.c.bf16 %v852_v44, %v850_v43  ;;  %1812 = vmatpush1.bf16.msra.mxu0 %v2475_v56 }
 0x22f   : > { %1813 = vmatprep.subr.bf16.mxu0 %v2480_v53 }
 0x230   : > { %1177 = vmatprep.mubr.bf16.mxu0 %v868_v46 }
 0x231   : > { %1178 = vmatmul.mubr.bf16.gmra.mrb[60].mxu0 %v867_v45 }
 0x232   : > { %1814 = vmatpush1.bf16.msra.mxu0 %v2478_v54 }
 0x233   : > { %1815 = vmatprep.subr.bf16.mxu0 %v2483_v57 }
 0x236   : > { %1816 = vmatpush1.bf16.msra.mxu0 %v2481_v58 }
 0x237   : > { %1817 = vmatprep.subr.bf16.mxu0 %v2486_v59 }
 0x23a   : > { %1818 = vmatpush1.bf16.msra.mxu0 %v2484_v60 }
 0x23b   : > { %1819 = vmatprep.subr.bf16.mxu0 %v2489_v61 }
 0x23e   : > { %1820 = vmatpush1.bf16.msra.mxu0 %v2487_v62 }
 0x23f   : > { %1821 = vmatprep.subr.bf16.mxu0 %v2492_v63 }
 0x242   : > { %1822 = vmatpush1.bf16.msra.mxu0 %v2490_v0 }
 0x243   : > { %1823 = vmatprep.subr.bf16.mxu0 %v2495_v1 }
 0x246   : > { %1824 = vmatpush1.bf16.msra.mxu0 %v2493_v2 }
 0x247   : > { %1825 = vmatprep.subr.bf16.mxu0 %v2498_v3 }
 0x24a   : > { %1826 = vmatpush1.bf16.msra.mxu0 %v2496_v4 }
 0x24b   : > { %1827 = vmatprep.subr.bf16.mxu0 %v2501_v5 }
 0x24e   : > { %1828 = vmatpush1.bf16.msra.mxu0 %v2499_v6 }
 0x24f   : > { %1829 = vmatprep.subr.bf16.mxu0 %v2504_v7 }
 0x252   : > { %1830 = vmatpush1.bf16.msra.mxu0 %v2502_v8 }
 0x253   : > { %1831 = vmatprep.subr.bf16.mxu0 %v2507_v9 }
 0x256   : > { %1832 = vmatpush1.bf16.msra.mxu0 %v2505_v10 }
 0x257   : > { %1833 = vmatprep.subr.bf16.mxu0 %v2510_v11 }
 0x25a   : > { %1834 = vmatpush1.bf16.msra.mxu0 %v2508_v12 }
 0x25b   : > { %1835 = vmatprep.subr.bf16.mxu0 %v2513_v13 }
 0x25e   : > { %1836 = vmatpush1.bf16.msra.mxu0 %v2511_v14 }
 0x2cc   : > { %v1109_v18 = vpop.f32.mrb[32].mxu0 }
 0x2cd   : > { %v1110_v19 = vadd.f32 %v1109_v18, %v2873_v16  ;;  %v1111_v20 = vpop.f32.mrb[33].mxu0 }
 0x2ce   : > { %v1112_v21 = vadd.f32 %v1111_v20, %v2876_v17  ;;  %v1113_v22 = vpop.f32.mrb[34].mxu0 }
 0x2cf   : > { %v1114_v23 = vadd.f32 %v1113_v22, %v2873_v16  ;;  %v1115_v30 = vpop.f32.mrb[35].mxu0  ;;  %v1188_v25 = vmax.f32 %v1110_v19, 0.0 }
 0x2d0   : > { %v1116_v24 = vadd.f32 %v1115_v30, %v2876_v17  ;;  %v1189_v26 = vmax.f32 %v1112_v21, 0.0 }
 0x2d1   : > { %v1190_v31 = vmax.f32 %v1114_v23, 0.0 }
 0x2d2   : > { %v1191_v28 = vmax.f32 %v1116_v24, 0.0 }
 0x2d3   : > { %v1220_v32 = vpack.c.bf16 %v1190_v31, %v1188_v25 }
 0x2d4   : > { %v1221_v33 = vpack.c.bf16 %v1191_v28, %v1189_v26  ;;  %v1119_v34 = vpop.f32.mrb[36].mxu0 }
 0x2d5   : > { %v1120_v35 = vadd.f32 %v1119_v34, %v2873_v16  ;;  %v1121_v36 = vpop.f32.mrb[37].mxu0 }
 0x2d6   : > { %v1122_v37 = vadd.f32 %v1121_v36, %v2876_v17  ;;  %v1123_v38 = vpop.f32.mrb[38].mxu0  ;;  %1474 = vmatprep.mubr.bf16.mxu1 %v1221_v33 }
 0x2d7   : > { %v1124_v39 = vadd.f32 %v1123_v38, %v2873_v16  ;;  %v1125_v40 = vpop.f32.mrb[39].mxu0  ;;  %1475 = vmatmul.mubr.bf16.vlgmr.msra.gmra.mrb[32].mxu1 %v1220_v32  ;;  %v1192_v42 = vmax.f32 %v1120_v35, 0.0 }
 0x2d8   : > { %v1126_v41 = vadd.f32 %v1125_v40, %v2876_v17  ;;  %v1193_v44 = vmax.f32 %v1122_v37, 0.0 }
 0x2d9   : > { %v1194_v43 = vmax.f32 %v1124_v39, 0.0 }
 0x2da   : > { %v1195_v45 = vmax.f32 %v1126_v41, 0.0 }
 0x2db   : > { %v1222_v46 = vpack.c.bf16 %v1194_v43, %v1192_v42 }
 0x2dc   : > { %v1223_v47 = vpack.c.bf16 %v1195_v45, %v1193_v44  ;;  %v1129_v48 = vpop.f32.mrb[40].mxu0 }
 0x2dd   : > { %v1130_v49 = vadd.f32 %v1129_v48, %v2873_v16  ;;  %v1131_v50 = vpop.f32.mrb[41].mxu0 }
 0x2de   : > { %v1132_v55 = vadd.f32 %v1131_v50, %v2876_v17  ;;  %v1133_v51 = vpop.f32.mrb[42].mxu0  ;;  %1484 = vmatprep.mubr.bf16.mxu1 %v1223_v47 }
 0x2df   : > { %v1134_v52 = vadd.f32 %v1133_v51, %v2873_v16  ;;  %v1135_v56 = vpop.f32.mrb[43].mxu0  ;;  %1485 = vmatmul.mubr.bf16.gmra.mrb[36].mxu1 %v1222_v46  ;;  %v1196_v54 = vmax.f32 %v1130_v49, 0.0 }
 0x2e0   : > { %v1136_v53 = vadd.f32 %v1135_v56, %v2876_v17  ;;  %v1197_v58 = vmax.f32 %v1132_v55, 0.0 }
 0x2e1   : > { %v1198_v57 = vmax.f32 %v1134_v52, 0.0 }
 0x2e2   : > { %v1199_v59 = vmax.f32 %v1136_v53, 0.0 }
 0x2e3   : > { %v1224_v60 = vpack.c.bf16 %v1198_v57, %v1196_v54 }
 0x2e4   : > { %v1225_v61 = vpack.c.bf16 %v1199_v59, %v1197_v58  ;;  %v1139_v62 = vpop.f32.mrb[44].mxu0 }
 0x2e5   : > { %v1140_v63 = vadd.f32 %v1139_v62, %v2873_v16  ;;  %v1141_v0 = vpop.f32.mrb[45].mxu0 }
 0x2e6   : > { %v1142_v1 = vadd.f32 %v1141_v0, %v2876_v17  ;;  %v1143_v2 = vpop.f32.mrb[46].mxu0  ;;  %1494 = vmatprep.mubr.bf16.mxu1 %v1225_v61 }
 0x2e7   : > { %v1144_v3 = vadd.f32 %v1143_v2, %v2873_v16  ;;  %v1145_v4 = vpop.f32.mrb[47].mxu0  ;;  %1495 = vmatmul.mubr.bf16.gmra.mrb[40].mxu1 %v1224_v60  ;;  %v1200_v6 = vmax.f32 %v1140_v63, 0.0 }
 0x2e8   : > { %v1146_v5 = vadd.f32 %v1145_v4, %v2876_v17  ;;  %v1201_v8 = vmax.f32 %v1142_v1, 0.0 }
 0x2e9   : > { %v1202_v7 = vmax.f32 %v1144_v3, 0.0 }
 0x2ea   : > { %v1203_v9 = vmax.f32 %v1146_v5, 0.0 }
 0x2eb   : > { %v1226_v10 = vpack.c.bf16 %v1202_v7, %v1200_v6 }
 0x2ec   : > { %v1227_v11 = vpack.c.bf16 %v1203_v9, %v1201_v8  ;;  %v1149_v12 = vpop.f32.mrb[48].mxu0  ;;  %v2516_v8 = vld [vmem:[#allocation2 + $0x3e4] ss:$8 sps:$4 sm:$0xff]   ;;  %v2514_v9 = vld [vmem:[#allocation2 + $0x3e0] ss:$8 sps:$4 sm:$0xff]  }
 0x2ed   : > { %v1150_v13 = vadd.f32 %v1149_v12, %v2873_v16  ;;  %v1151_v14 = vpop.f32.mrb[49].mxu0  ;;  %1837 = vmatprep.subr.bf16.mxu0 %v2516_v8 }
 0x2ee   : > { %v1152_v15 = vadd.f32 %v1151_v14, %v2876_v17  ;;  %v1153_v18 = vpop.f32.mrb[50].mxu0  ;;  %1504 = vmatprep.mubr.bf16.mxu1 %v1227_v11  ;;  %1838 = vmatpush1.bf16.msra.mxu0 %v2514_v9  ;;  %v2517_v11 = vld [vmem:[#allocation2 + $0x3f0] ss:$8 sps:$4 sm:$0xff]  }
 0x2ef   : > { %v1154_v19 = vadd.f32 %v1153_v18, %v2873_v16  ;;  %v1155_v20 = vpop.f32.mrb[51].mxu0  ;;  %1505 = vmatmul.mubr.bf16.gmra.mrb[44].mxu1 %v1226_v10  ;;  %v1204_v22 = vmax.f32 %v1150_v13, 0.0  ;;  %v2519_v10 = vld [vmem:[#allocation2 + $0x3f4] ss:$8 sps:$4 sm:$0xff]  }
 0x2f0   : > { %v1156_v21 = vadd.f32 %v1155_v20, %v2876_v17  ;;  %v1205_v30 = vmax.f32 %v1152_v15, 0.0  ;;  %1839 = vmatprep.subr.bf16.mxu0 %v2519_v10 }
 0x2f1   : > { %v1206_v23 = vmax.f32 %v1154_v19, 0.0 }
 0x2f2   : > { %v1207_v24 = vmax.f32 %v1156_v21, 0.0  ;;  %1840 = vmatpush1.bf16.msra.mxu0 %v2517_v11 }
 0x2f3   : > { %v1228_v25 = vpack.c.bf16 %v1206_v23, %v1204_v22 }
 0x2f4   : > { %v1229_v31 = vpack.c.bf16 %v1207_v24, %v1205_v30  ;;  %v1159_v26 = vpop.f32.mrb[52].mxu0 }
 0x2f5   : > { %v1160_v28 = vadd.f32 %v1159_v26, %v2873_v16  ;;  %v1161_v32 = vpop.f32.mrb[53].mxu0 }
 0x2f6   : > { %v1162_v33 = vadd.f32 %v1161_v32, %v2876_v17  ;;  %v1163_v34 = vpop.f32.mrb[54].mxu0  ;;  %1514 = vmatprep.mubr.bf16.mxu1 %v1229_v31 }
 0x2f7   : > { %v1164_v35 = vadd.f32 %v1163_v34, %v2873_v16  ;;  %v1165_v36 = vpop.f32.mrb[55].mxu0  ;;  %1515 = vmatmul.mubr.bf16.gmra.mrb[48].mxu1 %v1228_v25  ;;  %v1208_v38 = vmax.f32 %v1160_v28, 0.0 }
 0x2f8   : > { %v1166_v37 = vadd.f32 %v1165_v36, %v2876_v17  ;;  %v1209_v40 = vmax.f32 %v1162_v33, 0.0 }
 0x2f9   : > { %v1210_v39 = vmax.f32 %v1164_v35, 0.0 }
 0x2fa   : > { %v1211_v41 = vmax.f32 %v1166_v37, 0.0 }
 0x2fb   : > { %v1230_v42 = vpack.c.bf16 %v1210_v39, %v1208_v38 }
 0x2fc   : > { %v1231_v43 = vpack.c.bf16 %v1211_v41, %v1209_v40  ;;  %v1169_v44 = vpop.f32.mrb[56].mxu0 }
 0x2fd   : > { %v1170_v45 = vadd.f32 %v1169_v44, %v2873_v16  ;;  %v1171_v46 = vpop.f32.mrb[57].mxu0 }
 0x2fe   : > { %v1172_v47 = vadd.f32 %v1171_v46, %v2876_v17  ;;  %v1173_v48 = vpop.f32.mrb[58].mxu0  ;;  %1524 = vmatprep.mubr.bf16.mxu1 %v1231_v43 }
 0x2ff   : > { %v1174_v49 = vadd.f32 %v1173_v48, %v2873_v16  ;;  %v1175_v50 = vpop.f32.mrb[59].mxu0  ;;  %1525 = vmatmul.mubr.bf16.gmra.mrb[52].mxu1 %v1230_v42  ;;  %v1212_v51 = vmax.f32 %v1170_v45, 0.0 }
 0x300   : > { %v1176_v55 = vadd.f32 %v1175_v50, %v2876_v17  ;;  %v1213_v56 = vmax.f32 %v1172_v47, 0.0 }
 0x301   : > { %v1214_v52 = vmax.f32 %v1174_v49, 0.0 }
 0x302   : > { %v1215_v53 = vmax.f32 %v1176_v55, 0.0 }
 0x303   : > { %v1232_v54 = vpack.c.bf16 %v1214_v52, %v1212_v51 }
 0x304   : > { %v1233_v57 = vpack.c.bf16 %v1215_v53, %v1213_v56  ;;  %v1179_v58 = vpop.f32.mrb[60].mxu0 }
 0x305   : > { %v1180_v59 = vadd.f32 %v1179_v58, %v2873_v16  ;;  %v1181_v60 = vpop.f32.mrb[61].mxu0 }
 0x306   : > { %v1182_v61 = vadd.f32 %v1181_v60, %v2876_v17  ;;  %v1183_v62 = vpop.f32.mrb[62].mxu0  ;;  %1534 = vmatprep.mubr.bf16.mxu1 %v1233_v57 }
 0x307   : > { %v1184_v63 = vadd.f32 %v1183_v62, %v2873_v16  ;;  %v1185_v0 = vpop.f32.mrb[63].mxu0  ;;  %1535 = vmatmul.mubr.bf16.gmra.mrb[56].mxu1 %v1232_v54  ;;  %v1216_v2 = vmax.f32 %v1180_v59, 0.0  ;;  %v2201_v16 = vld [vmem:[%s3054_s4 + $0x6] sm:$0x3] }
 0x308   : > { %v1186_v1 = vadd.f32 %v1185_v0, %v2876_v17  ;;  %v1217_v4 = vmax.f32 %v1182_v61, 0.0  ;;  %v2914_v17 = vrot.slane %v2201_v16, %v2783_v27  ;;  %v2917_v12 = vrot.slane %v2201_v16, %v2788_v29 }
 0x309   : > { %v1218_v3 = vmax.f32 %v1184_v63, 0.0 }
 0x30a   : > { %v1219_v5 = vmax.f32 %v1186_v1, 0.0 }
 0x30b   : > { %v1234_v6 = vpack.c.bf16 %v1218_v3, %v1216_v2 }
 0x30c   : > { %v1235_v7 = vpack.c.bf16 %v1219_v5, %v1217_v4 }
 0x30e   : > { %1544 = vmatprep.mubr.bf16.mxu1 %v1235_v7 }
 0x30f   : > { %1545 = vmatmul.mubr.bf16.gmra.mrb[60].mxu1 %v1234_v6 }
 0x3aa   : > { %v1476_v13 = vpop.f32.mrb[32].mxu1 }
 0x3ab   : > { %v1477_v14 = vadd.f32 %v1476_v13, %v2914_v17  ;;  %v1478_v15 = vpop.f32.mrb[33].mxu1 }
 0x3ac   : > { %v1479_v18 = vadd.f32 %v1478_v15, %v2917_v12  ;;  %v1480_v19 = vpop.f32.mrb[34].mxu1 }
 0x3ad   : > { %v1481_v20 = vadd.f32 %v1480_v19, %v2914_v17  ;;  %v1482_v21 = vpop.f32.mrb[35].mxu1  ;;  %v1555_v23 = vmax.f32 %v1477_v14, 0.0 }
 0x3ae   : > { %v1483_v22 = vadd.f32 %v1482_v21, %v2917_v12  ;;  %v1556_v24 = vmax.f32 %v1479_v18, 0.0 }
 0x3af   : > { %v1557_v30 = vmax.f32 %v1481_v20, 0.0 }
 0x3b0   : > { %v1558_v25 = vmax.f32 %v1483_v22, 0.0 }
 0x3b1   : > { %v1587_v31 = vpack.c.bf16 %v1557_v30, %v1555_v23 }
 0x3b2   : > { %v1588_v26 = vpack.c.bf16 %v1558_v25, %v1556_v24  ;;  %v1486_v28 = vpop.f32.mrb[36].mxu1 }
 0x3b3   : > { %v1487_v32 = vadd.f32 %v1486_v28, %v2914_v17  ;;  %v1488_v33 = vpop.f32.mrb[37].mxu1 }
 0x3b4   : > { %v1489_v34 = vadd.f32 %v1488_v33, %v2917_v12  ;;  %v1490_v35 = vpop.f32.mrb[38].mxu1  ;;  %1841 = vmatprep.mubr.bf16.mxu0 %v1588_v26 }
 0x3b5   : > { %v1491_v36 = vadd.f32 %v1490_v35, %v2914_v17  ;;  %v1492_v37 = vpop.f32.mrb[39].mxu1  ;;  %1842 = vmatmul.mubr.bf16.vlgmr.msra.gmra.mrb[64].mxu0 %v1587_v31  ;;  %v1559_v39 = vmax.f32 %v1487_v32, 0.0 }
 0x3b6   : > { %v1493_v38 = vadd.f32 %v1492_v37, %v2917_v12  ;;  %v1560_v41 = vmax.f32 %v1489_v34, 0.0 }
 0x3b7   : > { %v1561_v40 = vmax.f32 %v1491_v36, 0.0 }
 0x3b8   : > { %v1562_v42 = vmax.f32 %v1493_v38, 0.0 }
 0x3b9   : > { %v1589_v43 = vpack.c.bf16 %v1561_v40, %v1559_v39 }
 0x3ba   : > { %v1590_v44 = vpack.c.bf16 %v1562_v42, %v1560_v41  ;;  %v1496_v45 = vpop.f32.mrb[40].mxu1 }
 0x3bb   : > { %v1497_v46 = vadd.f32 %v1496_v45, %v2914_v17  ;;  %v1498_v47 = vpop.f32.mrb[41].mxu1 }
 0x3bc   : > { %v1499_v48 = vadd.f32 %v1498_v47, %v2917_v12  ;;  %v1500_v49 = vpop.f32.mrb[42].mxu1  ;;  %1851 = vmatprep.mubr.bf16.mxu0 %v1590_v44 }
 0x3bd   : > { %v1501_v50 = vadd.f32 %v1500_v49, %v2914_v17  ;;  %v1502_v55 = vpop.f32.mrb[43].mxu1  ;;  %1852 = vmatmul.mubr.bf16.gmra.mrb[68].mxu0 %v1589_v43  ;;  %v1563_v52 = vmax.f32 %v1497_v46, 0.0 }
 0x3be   : > { %v1503_v51 = vadd.f32 %v1502_v55, %v2917_v12  ;;  %v1564_v53 = vmax.f32 %v1499_v48, 0.0 }
 0x3bf   : > { %v1565_v56 = vmax.f32 %v1501_v50, 0.0 }
 0x3c0   : > { %v1566_v54 = vmax.f32 %v1503_v51, 0.0 }
 0x3c1   : > { %v1591_v57 = vpack.c.bf16 %v1565_v56, %v1563_v52 }
 0x3c2   : > { %v1592_v58 = vpack.c.bf16 %v1566_v54, %v1564_v53  ;;  %v1506_v59 = vpop.f32.mrb[44].mxu1 }
 0x3c3   : > { %v1507_v60 = vadd.f32 %v1506_v59, %v2914_v17  ;;  %v1508_v61 = vpop.f32.mrb[45].mxu1 }
 0x3c4   : > { %v1509_v62 = vadd.f32 %v1508_v61, %v2917_v12  ;;  %v1510_v63 = vpop.f32.mrb[46].mxu1  ;;  %1861 = vmatprep.mubr.bf16.mxu0 %v1592_v58 }
 0x3c5   : > { %v1511_v0 = vadd.f32 %v1510_v63, %v2914_v17  ;;  %v1512_v1 = vpop.f32.mrb[47].mxu1  ;;  %1862 = vmatmul.mubr.bf16.gmra.mrb[72].mxu0 %v1591_v57  ;;  %v1567_v3 = vmax.f32 %v1507_v60, 0.0 }
 0x3c6   : > { %v1513_v2 = vadd.f32 %v1512_v1, %v2917_v12  ;;  %v1568_v5 = vmax.f32 %v1509_v62, 0.0 }
 0x3c7   : > { %v1569_v4 = vmax.f32 %v1511_v0, 0.0 }
 0x3c8   : > { %v1570_v6 = vmax.f32 %v1513_v2, 0.0 }
 0x3c9   : > { %v1593_v7 = vpack.c.bf16 %v1569_v4, %v1567_v3 }
 0x3ca   : > { %v1594_v8 = vpack.c.bf16 %v1570_v6, %v1568_v5  ;;  %v1516_v9 = vpop.f32.mrb[48].mxu1  ;;  %v2954_v5 = vld.sshfl [vmem:[%s3053_s3] sm:$0x33 pattern:$0x76325410] }
 0x3cb   : > { %v1517_v10 = vadd.f32 %v1516_v9, %v2914_v17  ;;  %v1518_v11 = vpop.f32.mrb[49].mxu1  ;;  %v2234_v6 = vld [vmem:[%s3054_s4 + $0x8] sm:$0x3] }
 0x3cc   : > { %v1519_v16 = vadd.f32 %v1518_v11, %v2917_v12  ;;  %v1520_v13 = vpop.f32.mrb[50].mxu1  ;;  %1871 = vmatprep.mubr.bf16.mxu0 %v1594_v8  ;;  %v2968_v8 = vrot.slane %v2234_v6, %v2788_v29 }
 0x3cd   : > { %v1521_v14 = vadd.f32 %v1520_v13, %v2914_v17  ;;  %v1522_v15 = vpop.f32.mrb[51].mxu1  ;;  %1872 = vmatmul.mubr.bf16.gmra.mrb[76].mxu0 %v1593_v7  ;;  %v1571_v19 = vmax.f32 %v1517_v10, 0.0  ;;  %v2965_v7 = vrot.slane %v2234_v6, %v2783_v27 }
 0x3ce   : > { %v1523_v18 = vadd.f32 %v1522_v15, %v2917_v12  ;;  %v1572_v21 = vmax.f32 %v1519_v16, 0.0 }
 0x3cf   : > { %v1573_v20 = vmax.f32 %v1521_v14, 0.0 }
 0x3d0   : > { %v1574_v22 = vmax.f32 %v1523_v18, 0.0 }
 0x3d1   : > { %v1595_v23 = vpack.c.bf16 %v1573_v20, %v1571_v19 }
 0x3d2   : > { %v1596_v30 = vpack.c.bf16 %v1574_v22, %v1572_v21  ;;  %v1526_v24 = vpop.f32.mrb[52].mxu1 }
 0x3d3   : > { %v1527_v25 = vadd.f32 %v1526_v24, %v2914_v17  ;;  %v1528_v31 = vpop.f32.mrb[53].mxu1 }
 0x3d4   : > { %v1529_v26 = vadd.f32 %v1528_v31, %v2917_v12  ;;  %v1530_v28 = vpop.f32.mrb[54].mxu1  ;;  %1881 = vmatprep.mubr.bf16.mxu0 %v1596_v30 }
 0x3d5   : > { %v1531_v32 = vadd.f32 %v1530_v28, %v2914_v17  ;;  %v1532_v33 = vpop.f32.mrb[55].mxu1  ;;  %1882 = vmatmul.mubr.bf16.gmra.mrb[80].mxu0 %v1595_v23  ;;  %v1575_v35 = vmax.f32 %v1527_v25, 0.0 }
 0x3d6   : > { %v1533_v34 = vadd.f32 %v1532_v33, %v2917_v12  ;;  %v1576_v37 = vmax.f32 %v1529_v26, 0.0 }
 0x3d7   : > { %v1577_v36 = vmax.f32 %v1531_v32, 0.0 }
 0x3d8   : > { %v1578_v38 = vmax.f32 %v1533_v34, 0.0 }
 0x3d9   : > { %v1597_v39 = vpack.c.bf16 %v1577_v36, %v1575_v35 }
 0x3da   : > { %v1598_v40 = vpack.c.bf16 %v1578_v38, %v1576_v37  ;;  %v1536_v41 = vpop.f32.mrb[56].mxu1 }
 0x3db   : > { %v1537_v42 = vadd.f32 %v1536_v41, %v2914_v17  ;;  %v1538_v43 = vpop.f32.mrb[57].mxu1 }
 0x3dc   : > { %v1539_v44 = vadd.f32 %v1538_v43, %v2917_v12  ;;  %v1540_v45 = vpop.f32.mrb[58].mxu1  ;;  %1891 = vmatprep.mubr.bf16.mxu0 %v1598_v40 }
 0x3dd   : > { %v1541_v46 = vadd.f32 %v1540_v45, %v2914_v17  ;;  %v1542_v47 = vpop.f32.mrb[59].mxu1  ;;  %1892 = vmatmul.mubr.bf16.gmra.mrb[84].mxu0 %v1597_v39  ;;  %v1579_v49 = vmax.f32 %v1537_v42, 0.0 }
 0x3de   : > { %v1543_v48 = vadd.f32 %v1542_v47, %v2917_v12  ;;  %v1580_v55 = vmax.f32 %v1539_v44, 0.0 }
 0x3df   : > { %v1581_v50 = vmax.f32 %v1541_v46, 0.0 }
 0x3e0   : > { %v1582_v51 = vmax.f32 %v1543_v48, 0.0 }
 0x3e1   : > { %v1599_v52 = vpack.c.bf16 %v1581_v50, %v1579_v49 }
 0x3e2   : > { %v1600_v56 = vpack.c.bf16 %v1582_v51, %v1580_v55  ;;  %v1546_v53 = vpop.f32.mrb[60].mxu1 }
 0x3e3   : > { %v1547_v54 = vadd.f32 %v1546_v53, %v2914_v17  ;;  %v1548_v57 = vpop.f32.mrb[61].mxu1 }
 0x3e4   : > { %v1549_v58 = vadd.f32 %v1548_v57, %v2917_v12  ;;  %v1550_v59 = vpop.f32.mrb[62].mxu1  ;;  %1901 = vmatprep.mubr.bf16.mxu0 %v1600_v56 }
 0x3e5   : > { %v1551_v60 = vadd.f32 %v1550_v59, %v2914_v17  ;;  %v1552_v61 = vpop.f32.mrb[63].mxu1  ;;  %1902 = vmatmul.mubr.bf16.gmra.mrb[88].mxu0 %v1599_v52  ;;  %v1583_v63 = vmax.f32 %v1547_v54, 0.0  ;;  %v1985_v17 = vcombine.high %v2954_v5, %v2954_v5 }
 0x3e6   : > { %v1553_v62 = vadd.f32 %v1552_v61, %v2917_v12  ;;  %v1584_v1 = vmax.f32 %v1549_v58, 0.0  ;;  %v1971_v12 = vld [vmem:[%s3055_s5] sm:$0xf] }
 0x3e7   : > { %v1585_v0 = vmax.f32 %v1551_v60, 0.0  ;;  %2020 = vmatprep.mubr.bf16.mxu1 %v1985_v17  ;;  %1974 = vperm.xlu0 %2325, %v1971_v12  }
 0x3e8   : > { %v1586_v2 = vmax.f32 %v1553_v62, 0.0 }
 0x3e9   : > { %v1601_v3 = vpack.c.bf16 %v1585_v0, %v1583_v63 }
 0x3ea   : > { %v1602_v4 = vpack.c.bf16 %v1586_v2, %v1584_v1 }
 0x3ec   : > { %1911 = vmatprep.mubr.bf16.mxu0 %v1602_v4 }
 0x3ed   : > { %1912 = vmatmul.mubr.bf16.gmra.mrb[92].mxu0 %v1601_v3 }
 0x488   : > { %v1843_v9 = vpop.f32.mrb[64].mxu0 }
 0x489   : > { %v1844_v10 = vadd.f32 %v1843_v9, %v2965_v7  ;;  %v1845_v11 = vpop.f32.mrb[65].mxu0 }
 0x48a   : > { %v1846_v16 = vadd.f32 %v1845_v11, %v2968_v8  ;;  %v1847_v13 = vpop.f32.mrb[66].mxu0 }
 0x48b   : > { %v1848_v14 = vadd.f32 %v1847_v13, %v2965_v7  ;;  %v1849_v15 = vpop.f32.mrb[67].mxu0  ;;  %v1922_v19 = vmax.f32 %v1844_v10, 0.0 }
 0x48c   : > { %v1850_v18 = vadd.f32 %v1849_v15, %v2968_v8  ;;  %v1923_v21 = vmax.f32 %v1846_v16, 0.0 }
 0x48d   : > { %v1924_v20 = vmax.f32 %v1848_v14, 0.0 }
 0x48e   : > { %v1925_v27 = vmax.f32 %v1850_v18, 0.0 }
 0x48f   : > { %v1955_v22 = vpack.c.bf16 %v1924_v20, %v1922_v19 }
 0x490   : > { %v1956_v23 = vpack.c.bf16 %v1925_v27, %v1923_v21  ;;  %v1853_v29 = vpop.f32.mrb[68].mxu0 }
 0x491   : > { %v1854_v30 = vadd.f32 %v1853_v29, %v2965_v7  ;;  %v1855_v24 = vpop.f32.mrb[69].mxu0 }
 0x492   : > { %v1856_v25 = vadd.f32 %v1855_v24, %v2968_v8  ;;  %v1857_v31 = vpop.f32.mrb[70].mxu0  ;;  %1988 = vmatprep.subr.bf16.mxu1 %v1956_v23 }
 0x493   : > { %v1858_v26 = vadd.f32 %v1857_v31, %v2965_v7  ;;  %v1859_v28 = vpop.f32.mrb[71].mxu0  ;;  %1989 = vmatpush1.bf16.xpose.msra.mxu1 %v1955_v22  ;;  %v1926_v33 = vmax.f32 %v1854_v30, 0.0 }
 0x494   : > { %v1860_v32 = vadd.f32 %v1859_v28, %v2968_v8  ;;  %v1927_v35 = vmax.f32 %v1856_v25, 0.0 }
 0x495   : > { %v1928_v34 = vmax.f32 %v1858_v26, 0.0 }
 0x496   : > { %v1929_v36 = vmax.f32 %v1860_v32, 0.0 }
 0x497   : > { %v1957_v37 = vpack.c.bf16 %v1928_v34, %v1926_v33 }
 0x498   : > { %v1958_v38 = vpack.c.bf16 %v1929_v36, %v1927_v35  ;;  %v1863_v39 = vpop.f32.mrb[72].mxu0 }
 0x499   : > { %v1864_v40 = vadd.f32 %v1863_v39, %v2965_v7  ;;  %v1865_v41 = vpop.f32.mrb[73].mxu0 }
 0x49a   : > { %v1866_v42 = vadd.f32 %v1865_v41, %v2968_v8  ;;  %v1867_v43 = vpop.f32.mrb[74].mxu0  ;;  %1990 = vmatprep.subr.bf16.mxu1 %v1958_v38 }
 0x49b   : > { %v1868_v44 = vadd.f32 %v1867_v43, %v2965_v7  ;;  %v1869_v45 = vpop.f32.mrb[75].mxu0  ;;  %1991 = vmatpush1.bf16.xpose.msra.mxu1 %v1957_v37  ;;  %v1930_v47 = vmax.f32 %v1864_v40, 0.0 }
 0x49c   : > { %v1870_v46 = vadd.f32 %v1869_v45, %v2968_v8  ;;  %v1931_v49 = vmax.f32 %v1866_v42, 0.0 }
 0x49d   : > { %v1932_v48 = vmax.f32 %v1868_v44, 0.0 }
 0x49e   : > { %v1933_v50 = vmax.f32 %v1870_v46, 0.0 }
 0x49f   : > { %v1959_v55 = vpack.c.bf16 %v1932_v48, %v1930_v47 }
 0x4a0   : > { %v1960_v51 = vpack.c.bf16 %v1933_v50, %v1931_v49  ;;  %v1873_v52 = vpop.f32.mrb[76].mxu0 }
 0x4a1   : > { %v1874_v56 = vadd.f32 %v1873_v52, %v2965_v7  ;;  %v1875_v53 = vpop.f32.mrb[77].mxu0 }
 0x4a2   : > { %v1876_v54 = vadd.f32 %v1875_v53, %v2968_v8  ;;  %v1877_v57 = vpop.f32.mrb[78].mxu0  ;;  %1992 = vmatprep.subr.bf16.mxu1 %v1960_v51 }
 0x4a3   : > { %v1878_v58 = vadd.f32 %v1877_v57, %v2965_v7  ;;  %v1879_v59 = vpop.f32.mrb[79].mxu0  ;;  %1993 = vmatpush1.bf16.xpose.msra.mxu1 %v1959_v55  ;;  %v1934_v61 = vmax.f32 %v1874_v56, 0.0 }
 0x4a4   : > { %v1880_v60 = vadd.f32 %v1879_v59, %v2968_v8  ;;  %v1935_v63 = vmax.f32 %v1876_v54, 0.0 }
 0x4a5   : > { %v1936_v62 = vmax.f32 %v1878_v58, 0.0 }
 0x4a6   : > { %v1937_v0 = vmax.f32 %v1880_v60, 0.0 }
 0x4a7   : > { %v1961_v1 = vpack.c.bf16 %v1936_v62, %v1934_v61  ;;  %v1975_v62 = vpop.permute.xlu0 %1974 }
 0x4a8   : > { %v1962_v2 = vpack.c.bf16 %v1937_v0, %v1935_v63  ;;  %v1883_v3 = vpop.f32.mrb[80].mxu0 }
 0x4a9   : > { %v1884_v4 = vadd.f32 %v1883_v3, %v2965_v7  ;;  %v1885_v17 = vpop.f32.mrb[81].mxu0 }
 0x4aa   : > { %v1886_v12 = vadd.f32 %v1885_v17, %v2968_v8  ;;  %v1887_v6 = vpop.f32.mrb[82].mxu0  ;;  %1994 = vmatprep.subr.bf16.mxu1 %v1962_v2 }
 0x4ab   : > { %v1888_v9 = vadd.f32 %v1887_v6, %v2965_v7  ;;  %v1889_v10 = vpop.f32.mrb[83].mxu0  ;;  %1995 = vmatpush1.bf16.xpose.msra.mxu1 %v1961_v1  ;;  %v1938_v16 = vmax.f32 %v1884_v4, 0.0 }
 0x4ac   : > { %v1890_v11 = vadd.f32 %v1889_v10, %v2968_v8  ;;  %v1939_v14 = vmax.f32 %v1886_v12, 0.0 }
 0x4ad   : > { %v1940_v13 = vmax.f32 %v1888_v9, 0.0 }
 0x4ae   : > { %v1941_v15 = vmax.f32 %v1890_v11, 0.0 }
 0x4af   : > { %v1963_v18 = vpack.c.bf16 %v1940_v13, %v1938_v16 }
 0x4b0   : > { %v1964_v19 = vpack.c.bf16 %v1941_v15, %v1939_v14  ;;  %v1893_v20 = vpop.f32.mrb[84].mxu0 }
 0x4b1   : > { %v1894_v21 = vadd.f32 %v1893_v20, %v2965_v7  ;;  %v1895_v27 = vpop.f32.mrb[85].mxu0 }
 0x4b2   : > { %v1896_v22 = vadd.f32 %v1895_v27, %v2968_v8  ;;  %v1897_v23 = vpop.f32.mrb[86].mxu0  ;;  %1996 = vmatprep.subr.bf16.mxu1 %v1964_v19 }
 0x4b3   : > { %v1898_v29 = vadd.f32 %v1897_v23, %v2965_v7  ;;  %v1899_v30 = vpop.f32.mrb[87].mxu0  ;;  %1997 = vmatpush1.bf16.xpose.msra.mxu1 %v1963_v18  ;;  %v1942_v25 = vmax.f32 %v1894_v21, 0.0 }
 0x4b4   : > { %v1900_v24 = vadd.f32 %v1899_v30, %v2968_v8  ;;  %v1943_v26 = vmax.f32 %v1896_v22, 0.0 }
 0x4b5   : > { %v1944_v31 = vmax.f32 %v1898_v29, 0.0 }
 0x4b6   : > { %v1945_v28 = vmax.f32 %v1900_v24, 0.0 }
 0x4b7   : > { %v1965_v32 = vpack.c.bf16 %v1944_v31, %v1942_v25 }
 0x4b8   : > { %v1966_v33 = vpack.c.bf16 %v1945_v28, %v1943_v26  ;;  %v1903_v34 = vpop.f32.mrb[88].mxu0 }
 0x4b9   : > { %v1904_v35 = vadd.f32 %v1903_v34, %v2965_v7  ;;  %v1905_v36 = vpop.f32.mrb[89].mxu0 }
 0x4ba   : > { %v1906_v37 = vadd.f32 %v1905_v36, %v2968_v8  ;;  %v1907_v38 = vpop.f32.mrb[90].mxu0  ;;  %1998 = vmatprep.subr.bf16.mxu1 %v1966_v33 }
 0x4bb   : > { %v1908_v39 = vadd.f32 %v1907_v38, %v2965_v7  ;;  %v1909_v40 = vpop.f32.mrb[91].mxu0  ;;  %1999 = vmatpush1.bf16.xpose.msra.mxu1 %v1965_v32  ;;  %v1946_v42 = vmax.f32 %v1904_v35, 0.0 }
 0x4bc   : > { %v1910_v41 = vadd.f32 %v1909_v40, %v2968_v8  ;;  %v1947_v44 = vmax.f32 %v1906_v37, 0.0 }
 0x4bd   : > { %v1948_v43 = vmax.f32 %v1908_v39, 0.0 }
 0x4be   : > { %v1949_v45 = vmax.f32 %v1910_v41, 0.0 }
 0x4bf   : > { %v1967_v46 = vpack.c.bf16 %v1948_v43, %v1946_v42 }
 0x4c0   : > { %v1968_v47 = vpack.c.bf16 %v1949_v45, %v1947_v44  ;;  %v1913_v48 = vpop.f32.mrb[92].mxu0 }
 0x4c1   : > { %v1914_v49 = vadd.f32 %v1913_v48, %v2965_v7  ;;  %v1915_v50 = vpop.f32.mrb[93].mxu0 }
 0x4c2   : > { %v1916_v55 = vadd.f32 %v1915_v50, %v2968_v8  ;;  %v1917_v51 = vpop.f32.mrb[94].mxu0  ;;  %2000 = vmatprep.subr.bf16.mxu1 %v1968_v47 }
 0x4c3   : > { %v1918_v52 = vadd.f32 %v1917_v51, %v2965_v7  ;;  %v1919_v56 = vpop.f32.mrb[95].mxu0  ;;  %2001 = vmatpush1.bf16.xpose.msra.mxu1 %v1967_v46  ;;  %v1950_v54 = vmax.f32 %v1914_v49, 0.0 }
 0x4c4   : > { %v1920_v53 = vadd.f32 %v1919_v56, %v2968_v8  ;;  %v1951_v58 = vmax.f32 %v1916_v55, 0.0 }
 0x4c5   : > { %v1952_v57 = vmax.f32 %v1918_v52, 0.0 }
 0x4c6   : > { %v1953_v59 = vmax.f32 %v1920_v53, 0.0 }
 0x4c7   : > { %v1969_v60 = vpack.c.bf16 %v1952_v57, %v1950_v54 }
 0x4c8   : > { %v1970_v61 = vpack.c.bf16 %v1953_v59, %v1951_v58 }
 0x4ca   : > { %2002 = vmatprep.subr.bf16.mxu1 %v1970_v61 }
 0x4cb   : > { %2003 = vmatpush1.bf16.xpose.msra.mxu1 %v1969_v60 }
 0x4d2   : > { %2021 = vmatmul.mubr.bf16.vlgmr.msra.gmra.mrb[64].mxu1 %v2954_v5 }
 0x5a5   : > { %v2022_v63 = vpop.f32.mrb[64].mxu1 }
 0x5a6   : > { %v2023_v0 = vadd.f32 %v2022_v63, %v1975_v62  ;;  %v2024_v7 = vpop.f32.mrb[65].mxu1 }
 0x5a7   : > { %v2025_v1 = vpop.f32.mrb[66].mxu1 }
 0x5a8   : > { %2520 = vtanh.f32 %v2023_v0  ;;  %v2026_v8 = vpop.f32.mrb[67].mxu1 }
 0x5b2   : > { %v2521_v5 = vpop.eup %2520 }
 0x5b3   : > { %2029 = vst [vmem:[%s260_s19] sm:$0xf] %v2521_v5 }
 0x5b4   : > { %2563 = shalt.err (!%p2560_p7)
}
 0x5b5   : > { %s2564_s14 = scalar_lea.hbm %s3008_s29, 64  ;;  %s2568_s16 = scalar_lea.hbm %s3056_s6, 128 }
 0x5b6   : > { %p2565_p8 = scmp.ne.s32.totalorder %s3008_s29, %s2564_s14  ;;  %p2569_p1 = scmp.lt.u32.totalorder %s3008_s29, %s3056_s6 }
 0x5b7   : > { %p2570_p0 = scmp.lt.u32.totalorder %s2568_s16, %s2564_s14  ;;  %p2572_p6 = scmp.lt.u32.totalorder %s2564_s14, %s3008_s29 }
 0x5b8   : > { %p2566_p11 = pnand %p2565_p8, %p3067_p9 }
 0x5b9   : > { %p2571_p5 = por %p2570_p0, %p2569_p1 }
 0x5ba   : > { %p2567_p13 = pneg %p2566_p11 }
 0x5bb   : > { %p2573_p10 = por %p2572_p6, %p2571_p5 }
 0x5bd   : > { %p2574_p12 = pnand %p2573_p10, %p2567_p13 }
 0x5bf   : > { %2577 = shalt.err (!%p2574_p12)
}
 0x5c0   : > { %2276 = dma.vmem_to_hbm [thread:$0]  (%p3067_p9), %s3010_s20, 64, %s3008_s29, %s2031_s10  }
 0x5c1 PF: > { %p2288_p2 = scmp.ge.s32.totalorder %s2616_s24, 2  ;;  %s2056_s19 = sand.u32 1, %s2604_s21  }
 0x5c2   : > { %p3068_p3 = scmp.ne.s32.totalorder %s3061_s8, 0  ;;  %s2057_s26 = scalar_lea.sflag [#allocation4], %s2056_s19 }
 0x5c4   : > { %p2283_p4 = pnand %p2288_p2, %p3068_p3 }
 0x5c6   : > { %2599 = dma.done.wait (!%p2283_p4), %s2057_s26, 64  }
 0x5c7   : > { %2601 = vsyncadd (!%p2283_p4), %s2057_s26, 4294967232  ;;  %p17_p7 = scmp.ge.s32.totalorder %s2683_s27, 4   ;;  %s3069_s21 = smov %s2608_s22 }
 0x5c8   : > { %s3070_s22 = smov %s2612_s23  ;;  %s3071_s23 = smov %s2694_s30 }
 0x5c9   : > { %s3072_s24 = smov %s2683_s27  ;;  %19 = sbr.rel (!%p17_p7) target bundleno = 4 (0x4), region = 91 }
 0x5d0   :  { %2062 = vsyncpa [#allocation3], 1 }
 0x5d1   :  { %2064 = vsyncpa [#allocation3 + $0x1], 1 }
 0x5d2   :  { %2065 = vsyncpa [#allocation4], 1 }
 0x5d3   :  { %2067 = vsyncpa [#allocation4 + $0x1], 1 }

</bundles_post_ra>
